<compile_context>
chip_gen: v7x
topology: tpu7x:2x2x1
jax: 0.10.0
libtpu: 0.0.40
codegen_flags: <defaults>
</compile_context>

<pallas_src>
import jax
import jax.numpy as jnp
from jax.experimental import pallas as pl
from jax.experimental.pallas import tpu as pltpu

KS = 3                                   # hyperparams['net']['kernel_size']
STRIDE = 2                               # hyperparams['net']['stride']
OC = (8, 12)                             # hyperparams['net']['out_channels']
IMG = 28                                 # obs image H = W
H1 = (IMG - KS) // STRIDE + 1            # 13
H2 = (H1 - KS) // STRIDE + 1             # 6
FLAT_DIM = H2 * H2 * OC[1]               # 432, as hard-coded in the module
assert FLAT_DIM == 6 * 6 * 12


# ---------------------------------------------------------------------------
# BlockSpec helpers
# ---------------------------------------------------------------------------
def _sample_spec(full_shape):
    """Per-sample block over the leading (batch) axis; trailing dims full."""
    tail_zeros = (0,) * (len(full_shape) - 1)
    block = (1,) + tuple(full_shape[1:])
    return pl.BlockSpec(block, lambda i: (i,) + tail_zeros)


def _resident_spec(shape):
    """Whole-array block whose index never changes -> DMA'd once, VMEM-resident."""
    zeros = (0,) * len(shape)
    return pl.BlockSpec(tuple(shape), lambda i: zeros)


# ---------------------------------------------------------------------------
# The single fused kernel: conv1 -> conv2 -> fc1 -> fc2 -> fc3 for one sample
# ---------------------------------------------------------------------------
def _fused_kernel(p1_ref, act_ref, w1_ref, b1_ref, s2_ref, w2_ref, b2_ref,
                  wf_ref, wa_ref, bf1_ref, w2fc_ref, bf2_ref, w3_ref, b3_ref,
                  o_ref):
    f32 = jnp.float32

    # ---- conv1: (8,27) @ (27,169) + bias, ReLU -> lane-dense (Cout, Ho*Wo) ----
    p1 = p1_ref[0]                                                       # (27, 169)
    h1 = jnp.dot(w1_ref[...], p1, preferred_element_type=f32) + b1_ref[...]
    h1 = jnp.maximum(h1, 0.0)                                            # (8, 169)

    # ---- conv2 as implicit GEMM: 9 taps of (spatial-select matmul, weight matmul) ----
    acc2 = None
    for k in range(s2_ref.shape[0]):                                     # unrolled (9)
        patch = jnp.dot(h1, s2_ref[k], preferred_element_type=f32)       # (8, 36)
        term = jnp.dot(w2_ref[k], patch, preferred_element_type=f32)     # (12, 36)
        acc2 = term if acc2 is None else acc2 + term
    h2 = jnp.maximum(acc2 + b2_ref[...], 0.0)        # (12, 36) == NCHW flatten order

    # ---- fc1: split feature / action parts (the torch.cat is free this way) ----
    h = jnp.dot(act_ref[0], wa_ref[...], preferred_element_type=f32) + bf1_ref[...]
    for c in range(wf_ref.shape[0]):                                     # unrolled (12)
        h = h + jnp.dot(h2[c:c + 1, :], wf_ref[c], preferred_element_type=f32)
    h = jnp.maximum(h, 0.0)                                              # (1, 32)

    # ---- fc2 ----
    h = jnp.dot(h, w2fc_ref[...], preferred_element_type=f32) + bf2_ref[...]
    h = jnp.maximum(h, 0.0)                                              # (1, 32)

    # ---- fc3 (32 -> 1): VPU multiply + lane reduce (no N=1 MXU matmul) ----
    q = jnp.sum(h * w3_ref[...], axis=-1, keepdims=True) + b3_ref[...]   # (1, 1)
    o_ref[0] = q


# ---------------------------------------------------------------------------
# Host-side one-time weight re-layout and constant construction
# ---------------------------------------------------------------------------
def _build_conv2_selection():
    """S2t[k, q, p] = 1 iff input pixel q of the 13x13 map feeds output pixel p for tap k."""
    p = jnp.arange(H2 * H2)
    oh, ow = p // H2, p % H2
    mats = []
    for kh in range(KS):
        for kw in range(KS):
            q = (STRIDE * oh + kh) * H1 + (STRIDE * ow + kw)             # (36,)
            mats.append(jax.nn.one_hot(q, H1 * H1, dtype=jnp.float32).T)  # (169, 36)
    return jnp.stack(mats, axis=0)                                        # (9, 169, 36)


def prepare_params(params):
    """PyTorch-layout params -> kernel-friendly layouts (run once, outside the forward)."""
    c1w, c1b = params['conv1_w'], params['conv1_b']      # (8,3,3,3), (8,)
    c2w, c2b = params['conv2_w'], params['conv2_b']      # (12,8,3,3), (12,)
    f1w, f1b = params['fc1_w'], params['fc1_b']          # (32,436), (32,)
    f2w, f2b = params['fc2_w'], params['fc2_b']          # (32,32), (32,)
    f3w, f3b = params['fc3_w'], params['fc3_b']          # (1,32), (1,)
    oc1, cin = c1w.shape[0], c1w.shape[1]
    oc2 = c2w.shape[0]
    return {
        # conv1 as (Cout, kh*kw*cin) matching the im2col row order (kh, kw, ci)
        'w1':  c1w.transpose(0, 2, 3, 1).reshape(oc1, KS * KS * cin),     # (8, 27)
        'b1':  c1b.reshape(oc1, 1),
        's2t': _build_conv2_selection(),                                  # (9, 169, 36)
        'w2':  c2w.transpose(2, 3, 0, 1).reshape(KS * KS, oc2, oc1),      # (9, 12, 8)
        'b2':  c2b.reshape(oc2, 1),
        # fc1 split: feature rows reshaped to (C, H*W, out); action rows separate
        'wf1': f1w[:, :FLAT_DIM].T.reshape(oc2, H2 * H2, f1w.shape[0]),   # (12, 36, 32)
        'wa1': f1w[:, FLAT_DIM:].T,                                       # (act, 32)
        'bf1': f1b.reshape(1, -1),
        'w2fc': f2w.T,                                                    # (32, 32)
        'bf2': f2b.reshape(1, -1),
        'w3':  f3w,                                                       # (1, 32)
        'b3':  f3b.reshape(1, 1),
    }


def _im2col_conv1(obs):
    """NCHW obs -> (B, KS*KS*C, Ho*Wo) patches, rows ordered (kh, kw, ci), cols lane-dense."""
    # TODO(synk): conv1 patch extraction stays as one cheap XLA gather; a fully in-kernel
    # implicit GEMM for conv1 would need strided VMEM slicing (or a 4.8 MB selection matrix).
    B, C, H, W = obs.shape
    Ho = (H - KS) // STRIDE + 1
    Wo = (W - KS) // STRIDE + 1
    cols = []
    for kh in range(KS):
        for kw in range(KS):
            cols.append(obs[:, :, kh:kh + STRIDE * (Ho - 1) + 1:STRIDE,
                               kw:kw + STRIDE * (Wo - 1) + 1:STRIDE])     # (B, C, Ho, Wo)
    pat = jnp.stack(cols, axis=1)                                         # (B, 9, C, Ho, Wo)
    return pat.reshape(B, KS * KS * C, Ho * Wo)


# ---------------------------------------------------------------------------
# Forward pass
# ---------------------------------------------------------------------------
@jax.jit
def q_cnn_net_forward(prep, obs_nchw, act):
    """Equivalent of Q_cnn_net.forward(obs, act) -> shape (B,)."""
    B = obs_nchw.shape[0]
    p1 = _im2col_conv1(obs_nchw)                       # (B, 27, 169)
    act3 = act.reshape(B, 1, act.shape[-1])            # (B, 1, act_dim)

    w1, b1 = prep['w1'], prep['b1']
    s2t, w2r, b2 = prep['s2t'], prep['w2'], prep['b2']
    wf1, wa1, bf1 = prep['wf1'], prep['wa1'], prep['bf1']
    w2fc, bf2 = prep['w2fc'], prep['bf2']
    w3, b3 = prep['w3'], prep['b3']

    flops = B * (
        2 * w1.shape[0] * w1.shape[1] * p1.shape[2]
        + s2t.shape[0] * 2 * s2t.shape[2] * (w1.shape[0] * s2t.shape[1]
                                             + w2r.shape[1] * w2r.shape[2])
        + 2 * (FLAT_DIM + act.shape[1]) * wf1.shape[2]
        + 2 * w2fc.shape[0] * w2fc.shape[1]
        + 2 * w3.shape[1])
    bytes_accessed = 4 * (int(p1.size) + int(act3.size) + B
                          + sum(int(v.size) for v in prep.values()))

    out = pl.pallas_call(
        _fused_kernel,
        out_shape=jax.ShapeDtypeStruct((B, 1, 1), jnp.float32),
        grid=(B,),
        in_specs=[
            _sample_spec(p1.shape),
            _sample_spec(act3.shape),
            _resident_spec(w1.shape),
            _resident_spec(b1.shape),
            _resident_spec(s2t.shape),
            _resident_spec(w2r.shape),
            _resident_spec(b2.shape),
            _resident_spec(wf1.shape),
            _resident_spec(wa1.shape),
            _resident_spec(bf1.shape),
            _resident_spec(w2fc.shape),
            _resident_spec(bf2.shape),
            _resident_spec(w3.shape),
            _resident_spec(b3.shape),
        ],
        out_specs=pl.BlockSpec((1, 1, 1), lambda i: (i, 0, 0)),
        compiler_params=pltpu.CompilerParams(dimension_semantics=("parallel",)),
        cost_estimate=pl.CostEstimate(flops=int(flops), transcendentals=0,
                                      bytes_accessed=int(bytes_accessed)),
    )(p1, act3, w1, b1, s2t, w2r, b2, wf1, wa1, bf1, w2fc, bf2, w3, b3)
    return out.reshape(B)                              # torch.squeeze(out, -1)


# ---------------------------------------------------------------------------
# Deterministic parameter init (PyTorch-layout shapes implied by the module)
# ---------------------------------------------------------------------------
def init_params(key, cin=3, act_dim=4, layer_size=32):
    ks = jax.random.split(key, 10)

    def nrm(k, shape, scale=0.1):
        return scale * jax.random.normal(k, shape, dtype=jnp.float32)

    return {
        'conv1_w': nrm(ks[0], (OC[0], cin, KS, KS)),
        'conv1_b': nrm(ks[1], (OC[0],)),
        'conv2_w': nrm(ks[2], (OC[1], OC[0], KS, KS)),
        'conv2_b': nrm(ks[3], (OC[1],)),
        'fc1_w':   nrm(ks[4], (layer_size, FLAT_DIM + act_dim)),
        'fc1_b':   nrm(ks[5], (layer_size,)),
        'fc2_w':   nrm(ks[6], (layer_size, layer_size)),
        'fc2_b':   nrm(ks[7], (layer_size,)),
        'fc3_w':   nrm(ks[8], (1, layer_size)),
        'fc3_b':   nrm(ks[9], (1,)),
    }


def _reference_forward(params, obs_nchw, act):
    """Pure-JAX reference mirroring the PyTorch forward exactly (f32)."""
    def conv(x, w, b):
        y = jax.lax.conv_general_dilated(
            x, w, (STRIDE, STRIDE), 'VALID',
            dimension_numbers=('NCHW', 'OIHW', 'NCHW'))
        return jnp.maximum(y + b.reshape(1, -1, 1, 1), 0.0)

    h = conv(obs_nchw, params['conv1_w'], params['conv1_b'])
    h = conv(h, params['conv2_w'], params['conv2_b'])
    feat = h.reshape(h.shape[0], -1)                    # NCHW flatten == view(-1, 432)
    x = jnp.concatenate([feat, act], axis=1)
    h1 = jnp.maximum(x @ params['fc1_w'].T + params['fc1_b'], 0.0)
    h2 = jnp.maximum(h1 @ params['fc2_w'].T + params['fc2_b'], 0.0)
    out = h2 @ params['fc3_w'].T + params['fc3_b']
    return jnp.squeeze(out, -1)


if __name__ == "__main__":
    key = jax.random.PRNGKey(0)
    k_obs, k_act, k_par = jax.random.split(key, 3)

    B, C, H, W = 2, 3, 28, 28
    ACT_DIM, LAYER_SIZE = 4, 32

    obs = jax.random.normal(k_obs, (B, C, H, W), dtype=jnp.float32)   # NCHW like PyTorch
    act = jax.random.normal(k_act, (B, ACT_DIM), dtype=jnp.float32)
    params = init_params(k_par, cin=C, act_dim=ACT_DIM, layer_size=LAYER_SIZE)

    prep = prepare_params(params)                      # one-time host-side re-layout

    out = jax.block_until_ready(q_cnn_net_forward(prep, obs, act))
    ref = jax.block_until_ready(_reference_forward(params, obs, act))

    assert out.shape == (B,), out.shape
    assert jnp.allclose(out, ref, rtol=1e-2, atol=1e-3), (out, ref)
    print("KERNEL_OK")
</pallas_src>

<mosaic_0001>
module attributes {stable_mosaic.version = 11 : i64} {
  func.func @_fused_kernel(%arg0: i32, %arg1: memref<1x27x169xf32, #tpu.memory_space<vmem>>, %arg2: memref<1x1x4xf32, #tpu.memory_space<vmem>>, %arg3: memref<8x27xf32, #tpu.memory_space<vmem>>, %arg4: memref<8x1xf32, #tpu.memory_space<vmem>>, %arg5: memref<9x169x36xf32, #tpu.memory_space<vmem>>, %arg6: memref<9x12x8xf32, #tpu.memory_space<vmem>>, %arg7: memref<12x1xf32, #tpu.memory_space<vmem>>, %arg8: memref<12x36x32xf32, #tpu.memory_space<vmem>>, %arg9: memref<4x32xf32, #tpu.memory_space<vmem>>, %arg10: memref<1x32xf32, #tpu.memory_space<vmem>>, %arg11: memref<32x32xf32, #tpu.memory_space<vmem>>, %arg12: memref<1x32xf32, #tpu.memory_space<vmem>>, %arg13: memref<1x32xf32, #tpu.memory_space<vmem>>, %arg14: memref<1x1xf32, #tpu.memory_space<vmem>>, %arg15: memref<1x1x1xf32, #tpu.memory_space<vmem>>) attributes {dimension_semantics = [#tpu.dimension_semantics<parallel>], iteration_bounds = array<i64: 2>, scalar_prefetch = 0 : i64, scratch_operands = 0 : i64, tpu.core_type = #tpu.core_type<tc>, window_params = [{transform_indices = @transform_0, window_bounds = array<i64: 1, 27, 169>}, {transform_indices = @transform_1, window_bounds = array<i64: 1, 1, 4>}, {pipeline_mode = #tpu.pipeline_mode<synchronous>, transform_indices = @transform_2, window_bounds = array<i64: 8, 27>}, {pipeline_mode = #tpu.pipeline_mode<synchronous>, transform_indices = @transform_3, window_bounds = array<i64: 8, 1>}, {pipeline_mode = #tpu.pipeline_mode<synchronous>, transform_indices = @transform_4, window_bounds = array<i64: 9, 169, 36>}, {pipeline_mode = #tpu.pipeline_mode<synchronous>, transform_indices = @transform_5, window_bounds = array<i64: 9, 12, 8>}, {pipeline_mode = #tpu.pipeline_mode<synchronous>, transform_indices = @transform_6, window_bounds = array<i64: 12, 1>}, {pipeline_mode = #tpu.pipeline_mode<synchronous>, transform_indices = @transform_7, window_bounds = array<i64: 12, 36, 32>}, {pipeline_mode = #tpu.pipeline_mode<synchronous>, transform_indices = @transform_8, window_bounds = array<i64: 4, 32>}, {pipeline_mode = #tpu.pipeline_mode<synchronous>, transform_indices = @transform_9, window_bounds = array<i64: 1, 32>}, {pipeline_mode = #tpu.pipeline_mode<synchronous>, transform_indices = @transform_10, window_bounds = array<i64: 32, 32>}, {pipeline_mode = #tpu.pipeline_mode<synchronous>, transform_indices = @transform_11, window_bounds = array<i64: 1, 32>}, {pipeline_mode = #tpu.pipeline_mode<synchronous>, transform_indices = @transform_12, window_bounds = array<i64: 1, 32>}, {pipeline_mode = #tpu.pipeline_mode<synchronous>, transform_indices = @transform_13, window_bounds = array<i64: 1, 1>}, {transform_indices = @transform_14, window_bounds = array<i64: 1, 1, 1>}]} {
    %c0 = arith.constant 0 : index
    %c0_0 = arith.constant 0 : index
    %c0_1 = arith.constant 0 : index
    %0 = vector.load %arg1[%c0, %c0_0, %c0_1] : memref<1x27x169xf32, #tpu.memory_space<vmem>>, vector<1x27x169xf32>
    %1 = vector.shape_cast %0 : vector<1x27x169xf32> to vector<27x169xf32>
    %c0_2 = arith.constant 0 : index
    %c0_3 = arith.constant 0 : index
    %2 = vector.load %arg3[%c0_2, %c0_3] : memref<8x27xf32, #tpu.memory_space<vmem>>, vector<8x27xf32>
    %cst = arith.constant dense<0.000000e+00> : vector<8x169xf32>
    %3 = tpu.matmul %2, %1, %cst {dimension_numbers = #tpu.dot_dimension_numbers<[1], [0], [0], [1], [0, 0, 1, 1], [], []>} : vector<8x27xf32>, vector<27x169xf32>, vector<8x169xf32> -> vector<8x169xf32>
    %c0_4 = arith.constant 0 : index
    %c0_5 = arith.constant 0 : index
    %4 = vector.load %arg4[%c0_4, %c0_5] : memref<8x1xf32, #tpu.memory_space<vmem>>, vector<8x1xf32>
    %5 = vector.broadcast %4 : vector<8x1xf32> to vector<8x169xf32>
    %6 = arith.addf %3, %5 : vector<8x169xf32>
    %cst_6 = arith.constant 0.000000e+00 : f32
    %7 = vector.broadcast %cst_6 : f32 to vector<8x169xf32>
    %8 = arith.maximumf %6, %7 : vector<8x169xf32>
    %c0_7 = arith.constant 0 : index
    %c0_8 = arith.constant 0 : index
    %c0_9 = arith.constant 0 : index
    %9 = vector.load %arg5[%c0_7, %c0_8, %c0_9] : memref<9x169x36xf32, #tpu.memory_space<vmem>>, vector<1x169x36xf32>
    %10 = vector.shape_cast %9 : vector<1x169x36xf32> to vector<169x36xf32>
    %cst_10 = arith.constant dense<0.000000e+00> : vector<8x36xf32>
    %11 = tpu.matmul %8, %10, %cst_10 {dimension_numbers = #tpu.dot_dimension_numbers<[1], [0], [0], [1], [0, 0, 1, 1], [], []>} : vector<8x169xf32>, vector<169x36xf32>, vector<8x36xf32> -> vector<8x36xf32>
    %c0_11 = arith.constant 0 : index
    %c0_12 = arith.constant 0 : index
    %c0_13 = arith.constant 0 : index
    %12 = vector.load %arg6[%c0_11, %c0_12, %c0_13] : memref<9x12x8xf32, #tpu.memory_space<vmem>>, vector<1x12x8xf32>
    %13 = vector.shape_cast %12 : vector<1x12x8xf32> to vector<12x8xf32>
    %cst_14 = arith.constant dense<0.000000e+00> : vector<12x36xf32>
    %14 = tpu.matmul %13, %11, %cst_14 {dimension_numbers = #tpu.dot_dimension_numbers<[1], [0], [0], [1], [0, 0, 1, 1], [], []>} : vector<12x8xf32>, vector<8x36xf32>, vector<12x36xf32> -> vector<12x36xf32>
    %c1 = arith.constant 1 : index
    %c0_15 = arith.constant 0 : index
    %c0_16 = arith.constant 0 : index
    %15 = vector.load %arg5[%c1, %c0_15, %c0_16] : memref<9x169x36xf32, #tpu.memory_space<vmem>>, vector<1x169x36xf32>
    %16 = vector.shape_cast %15 : vector<1x169x36xf32> to vector<169x36xf32>
    %cst_17 = arith.constant dense<0.000000e+00> : vector<8x36xf32>
    %17 = tpu.matmul %8, %16, %cst_17 {dimension_numbers = #tpu.dot_dimension_numbers<[1], [0], [0], [1], [0, 0, 1, 1], [], []>} : vector<8x169xf32>, vector<169x36xf32>, vector<8x36xf32> -> vector<8x36xf32>
    %c1_18 = arith.constant 1 : index
    %c0_19 = arith.constant 0 : index
    %c0_20 = arith.constant 0 : index
    %18 = vector.load %arg6[%c1_18, %c0_19, %c0_20] : memref<9x12x8xf32, #tpu.memory_space<vmem>>, vector<1x12x8xf32>
    %19 = vector.shape_cast %18 : vector<1x12x8xf32> to vector<12x8xf32>
    %cst_21 = arith.constant dense<0.000000e+00> : vector<12x36xf32>
    %20 = tpu.matmul %19, %17, %cst_21 {dimension_numbers = #tpu.dot_dimension_numbers<[1], [0], [0], [1], [0, 0, 1, 1], [], []>} : vector<12x8xf32>, vector<8x36xf32>, vector<12x36xf32> -> vector<12x36xf32>
    %21 = arith.addf %14, %20 : vector<12x36xf32>
    %c2 = arith.constant 2 : index
    %c0_22 = arith.constant 0 : index
    %c0_23 = arith.constant 0 : index
    %22 = vector.load %arg5[%c2, %c0_22, %c0_23] : memref<9x169x36xf32, #tpu.memory_space<vmem>>, vector<1x169x36xf32>
    %23 = vector.shape_cast %22 : vector<1x169x36xf32> to vector<169x36xf32>
    %cst_24 = arith.constant dense<0.000000e+00> : vector<8x36xf32>
    %24 = tpu.matmul %8, %23, %cst_24 {dimension_numbers = #tpu.dot_dimension_numbers<[1], [0], [0], [1], [0, 0, 1, 1], [], []>} : vector<8x169xf32>, vector<169x36xf32>, vector<8x36xf32> -> vector<8x36xf32>
    %c2_25 = arith.constant 2 : index
    %c0_26 = arith.constant 0 : index
    %c0_27 = arith.constant 0 : index
    %25 = vector.load %arg6[%c2_25, %c0_26, %c0_27] : memref<9x12x8xf32, #tpu.memory_space<vmem>>, vector<1x12x8xf32>
    %26 = vector.shape_cast %25 : vector<1x12x8xf32> to vector<12x8xf32>
    %cst_28 = arith.constant dense<0.000000e+00> : vector<12x36xf32>
    %27 = tpu.matmul %26, %24, %cst_28 {dimension_numbers = #tpu.dot_dimension_numbers<[1], [0], [0], [1], [0, 0, 1, 1], [], []>} : vector<12x8xf32>, vector<8x36xf32>, vector<12x36xf32> -> vector<12x36xf32>
    %28 = arith.addf %21, %27 : vector<12x36xf32>
    %c3 = arith.constant 3 : index
    %c0_29 = arith.constant 0 : index
    %c0_30 = arith.constant 0 : index
    %29 = vector.load %arg5[%c3, %c0_29, %c0_30] : memref<9x169x36xf32, #tpu.memory_space<vmem>>, vector<1x169x36xf32>
    %30 = vector.shape_cast %29 : vector<1x169x36xf32> to vector<169x36xf32>
    %cst_31 = arith.constant dense<0.000000e+00> : vector<8x36xf32>
    %31 = tpu.matmul %8, %30, %cst_31 {dimension_numbers = #tpu.dot_dimension_numbers<[1], [0], [0], [1], [0, 0, 1, 1], [], []>} : vector<8x169xf32>, vector<169x36xf32>, vector<8x36xf32> -> vector<8x36xf32>
    %c3_32 = arith.constant 3 : index
    %c0_33 = arith.constant 0 : index
    %c0_34 = arith.constant 0 : index
    %32 = vector.load %arg6[%c3_32, %c0_33, %c0_34] : memref<9x12x8xf32, #tpu.memory_space<vmem>>, vector<1x12x8xf32>
    %33 = vector.shape_cast %32 : vector<1x12x8xf32> to vector<12x8xf32>
    %cst_35 = arith.constant dense<0.000000e+00> : vector<12x36xf32>
    %34 = tpu.matmul %33, %31, %cst_35 {dimension_numbers = #tpu.dot_dimension_numbers<[1], [0], [0], [1], [0, 0, 1, 1], [], []>} : vector<12x8xf32>, vector<8x36xf32>, vector<12x36xf32> -> vector<12x36xf32>
    %35 = arith.addf %28, %34 : vector<12x36xf32>
    %c4 = arith.constant 4 : index
    %c0_36 = arith.constant 0 : index
    %c0_37 = arith.constant 0 : index
    %36 = vector.load %arg5[%c4, %c0_36, %c0_37] : memref<9x169x36xf32, #tpu.memory_space<vmem>>, vector<1x169x36xf32>
    %37 = vector.shape_cast %36 : vector<1x169x36xf32> to vector<169x36xf32>
    %cst_38 = arith.constant dense<0.000000e+00> : vector<8x36xf32>
    %38 = tpu.matmul %8, %37, %cst_38 {dimension_numbers = #tpu.dot_dimension_numbers<[1], [0], [0], [1], [0, 0, 1, 1], [], []>} : vector<8x169xf32>, vector<169x36xf32>, vector<8x36xf32> -> vector<8x36xf32>
    %c4_39 = arith.constant 4 : index
    %c0_40 = arith.constant 0 : index
    %c0_41 = arith.constant 0 : index
    %39 = vector.load %arg6[%c4_39, %c0_40, %c0_41] : memref<9x12x8xf32, #tpu.memory_space<vmem>>, vector<1x12x8xf32>
    %40 = vector.shape_cast %39 : vector<1x12x8xf32> to vector<12x8xf32>
    %cst_42 = arith.constant dense<0.000000e+00> : vector<12x36xf32>
    %41 = tpu.matmul %40, %38, %cst_42 {dimension_numbers = #tpu.dot_dimension_numbers<[1], [0], [0], [1], [0, 0, 1, 1], [], []>} : vector<12x8xf32>, vector<8x36xf32>, vector<12x36xf32> -> vector<12x36xf32>
    %42 = arith.addf %35, %41 : vector<12x36xf32>
    %c5 = arith.constant 5 : index
    %c0_43 = arith.constant 0 : index
    %c0_44 = arith.constant 0 : index
    %43 = vector.load %arg5[%c5, %c0_43, %c0_44] : memref<9x169x36xf32, #tpu.memory_space<vmem>>, vector<1x169x36xf32>
    %44 = vector.shape_cast %43 : vector<1x169x36xf32> to vector<169x36xf32>
    %cst_45 = arith.constant dense<0.000000e+00> : vector<8x36xf32>
    %45 = tpu.matmul %8, %44, %cst_45 {dimension_numbers = #tpu.dot_dimension_numbers<[1], [0], [0], [1], [0, 0, 1, 1], [], []>} : vector<8x169xf32>, vector<169x36xf32>, vector<8x36xf32> -> vector<8x36xf32>
    %c5_46 = arith.constant 5 : index
    %c0_47 = arith.constant 0 : index
    %c0_48 = arith.constant 0 : index
    %46 = vector.load %arg6[%c5_46, %c0_47, %c0_48] : memref<9x12x8xf32, #tpu.memory_space<vmem>>, vector<1x12x8xf32>
    %47 = vector.shape_cast %46 : vector<1x12x8xf32> to vector<12x8xf32>
    %cst_49 = arith.constant dense<0.000000e+00> : vector<12x36xf32>
    %48 = tpu.matmul %47, %45, %cst_49 {dimension_numbers = #tpu.dot_dimension_numbers<[1], [0], [0], [1], [0, 0, 1, 1], [], []>} : vector<12x8xf32>, vector<8x36xf32>, vector<12x36xf32> -> vector<12x36xf32>
    %49 = arith.addf %42, %48 : vector<12x36xf32>
    %c6 = arith.constant 6 : index
    %c0_50 = arith.constant 0 : index
    %c0_51 = arith.constant 0 : index
    %50 = vector.load %arg5[%c6, %c0_50, %c0_51] : memref<9x169x36xf32, #tpu.memory_space<vmem>>, vector<1x169x36xf32>
    %51 = vector.shape_cast %50 : vector<1x169x36xf32> to vector<169x36xf32>
    %cst_52 = arith.constant dense<0.000000e+00> : vector<8x36xf32>
    %52 = tpu.matmul %8, %51, %cst_52 {dimension_numbers = #tpu.dot_dimension_numbers<[1], [0], [0], [1], [0, 0, 1, 1], [], []>} : vector<8x169xf32>, vector<169x36xf32>, vector<8x36xf32> -> vector<8x36xf32>
    %c6_53 = arith.constant 6 : index
    %c0_54 = arith.constant 0 : index
    %c0_55 = arith.constant 0 : index
    %53 = vector.load %arg6[%c6_53, %c0_54, %c0_55] : memref<9x12x8xf32, #tpu.memory_space<vmem>>, vector<1x12x8xf32>
    %54 = vector.shape_cast %53 : vector<1x12x8xf32> to vector<12x8xf32>
    %cst_56 = arith.constant dense<0.000000e+00> : vector<12x36xf32>
    %55 = tpu.matmul %54, %52, %cst_56 {dimension_numbers = #tpu.dot_dimension_numbers<[1], [0], [0], [1], [0, 0, 1, 1], [], []>} : vector<12x8xf32>, vector<8x36xf32>, vector<12x36xf32> -> vector<12x36xf32>
    %56 = arith.addf %49, %55 : vector<12x36xf32>
    %c7 = arith.constant 7 : index
    %c0_57 = arith.constant 0 : index
    %c0_58 = arith.constant 0 : index
    %57 = vector.load %arg5[%c7, %c0_57, %c0_58] : memref<9x169x36xf32, #tpu.memory_space<vmem>>, vector<1x169x36xf32>
    %58 = vector.shape_cast %57 : vector<1x169x36xf32> to vector<169x36xf32>
    %cst_59 = arith.constant dense<0.000000e+00> : vector<8x36xf32>
    %59 = tpu.matmul %8, %58, %cst_59 {dimension_numbers = #tpu.dot_dimension_numbers<[1], [0], [0], [1], [0, 0, 1, 1], [], []>} : vector<8x169xf32>, vector<169x36xf32>, vector<8x36xf32> -> vector<8x36xf32>
    %c7_60 = arith.constant 7 : index
    %c0_61 = arith.constant 0 : index
    %c0_62 = arith.constant 0 : index
    %60 = vector.load %arg6[%c7_60, %c0_61, %c0_62] : memref<9x12x8xf32, #tpu.memory_space<vmem>>, vector<1x12x8xf32>
    %61 = vector.shape_cast %60 : vector<1x12x8xf32> to vector<12x8xf32>
    %cst_63 = arith.constant dense<0.000000e+00> : vector<12x36xf32>
    %62 = tpu.matmul %61, %59, %cst_63 {dimension_numbers = #tpu.dot_dimension_numbers<[1], [0], [0], [1], [0, 0, 1, 1], [], []>} : vector<12x8xf32>, vector<8x36xf32>, vector<12x36xf32> -> vector<12x36xf32>
    %63 = arith.addf %56, %62 : vector<12x36xf32>
    %c8 = arith.constant 8 : index
    %c0_64 = arith.constant 0 : index
    %c0_65 = arith.constant 0 : index
    %64 = vector.load %arg5[%c8, %c0_64, %c0_65] : memref<9x169x36xf32, #tpu.memory_space<vmem>>, vector<1x169x36xf32>
    %65 = vector.shape_cast %64 : vector<1x169x36xf32> to vector<169x36xf32>
    %cst_66 = arith.constant dense<0.000000e+00> : vector<8x36xf32>
    %66 = tpu.matmul %8, %65, %cst_66 {dimension_numbers = #tpu.dot_dimension_numbers<[1], [0], [0], [1], [0, 0, 1, 1], [], []>} : vector<8x169xf32>, vector<169x36xf32>, vector<8x36xf32> -> vector<8x36xf32>
    %c8_67 = arith.constant 8 : index
    %c0_68 = arith.constant 0 : index
    %c0_69 = arith.constant 0 : index
    %67 = vector.load %arg6[%c8_67, %c0_68, %c0_69] : memref<9x12x8xf32, #tpu.memory_space<vmem>>, vector<1x12x8xf32>
    %68 = vector.shape_cast %67 : vector<1x12x8xf32> to vector<12x8xf32>
    %cst_70 = arith.constant dense<0.000000e+00> : vector<12x36xf32>
    %69 = tpu.matmul %68, %66, %cst_70 {dimension_numbers = #tpu.dot_dimension_numbers<[1], [0], [0], [1], [0, 0, 1, 1], [], []>} : vector<12x8xf32>, vector<8x36xf32>, vector<12x36xf32> -> vector<12x36xf32>
    %70 = arith.addf %63, %69 : vector<12x36xf32>
    %c0_71 = arith.constant 0 : index
    %c0_72 = arith.constant 0 : index
    %71 = vector.load %arg7[%c0_71, %c0_72] : memref<12x1xf32, #tpu.memory_space<vmem>>, vector<12x1xf32>
    %72 = vector.broadcast %71 : vector<12x1xf32> to vector<12x36xf32>
    %73 = arith.addf %70, %72 : vector<12x36xf32>
    %cst_73 = arith.constant 0.000000e+00 : f32
    %74 = vector.broadcast %cst_73 : f32 to vector<12x36xf32>
    %75 = arith.maximumf %73, %74 : vector<12x36xf32>
    %c0_74 = arith.constant 0 : index
    %c0_75 = arith.constant 0 : index
    %c0_76 = arith.constant 0 : index
    %76 = vector.load %arg2[%c0_74, %c0_75, %c0_76] : memref<1x1x4xf32, #tpu.memory_space<vmem>>, vector<1x1x4xf32>
    %77 = vector.shape_cast %76 : vector<1x1x4xf32> to vector<1x4xf32>
    %c0_77 = arith.constant 0 : index
    %c0_78 = arith.constant 0 : index
    %78 = vector.load %arg9[%c0_77, %c0_78] : memref<4x32xf32, #tpu.memory_space<vmem>>, vector<4x32xf32>
    %cst_79 = arith.constant dense<0.000000e+00> : vector<1x32xf32>
    %79 = tpu.matmul %77, %78, %cst_79 {dimension_numbers = #tpu.dot_dimension_numbers<[1], [0], [0], [1], [0, 0, 1, 1], [], []>} : vector<1x4xf32>, vector<4x32xf32>, vector<1x32xf32> -> vector<1x32xf32>
    %c0_80 = arith.constant 0 : index
    %c0_81 = arith.constant 0 : index
    %80 = vector.load %arg10[%c0_80, %c0_81] : memref<1x32xf32, #tpu.memory_space<vmem>>, vector<1x32xf32>
    %81 = arith.addf %79, %80 : vector<1x32xf32>
    %82 = vector.extract_strided_slice %75 {offsets = [0, 0], sizes = [1, 36], strides = [1, 1]} : vector<12x36xf32> to vector<1x36xf32>
    %c0_82 = arith.constant 0 : index
    %c0_83 = arith.constant 0 : index
    %c0_84 = arith.constant 0 : index
    %83 = vector.load %arg8[%c0_82, %c0_83, %c0_84] : memref<12x36x32xf32, #tpu.memory_space<vmem>>, vector<1x36x32xf32>
    %84 = vector.shape_cast %83 : vector<1x36x32xf32> to vector<36x32xf32>
    %cst_85 = arith.constant dense<0.000000e+00> : vector<1x32xf32>
    %85 = tpu.matmul %82, %84, %cst_85 {dimension_numbers = #tpu.dot_dimension_numbers<[1], [0], [0], [1], [0, 0, 1, 1], [], []>} : vector<1x36xf32>, vector<36x32xf32>, vector<1x32xf32> -> vector<1x32xf32>
    %86 = arith.addf %81, %85 : vector<1x32xf32>
    %87 = vector.extract_strided_slice %75 {offsets = [1, 0], sizes = [1, 36], strides = [1, 1]} : vector<12x36xf32> to vector<1x36xf32>
    %c1_86 = arith.constant 1 : index
    %c0_87 = arith.constant 0 : index
    %c0_88 = arith.constant 0 : index
    %88 = vector.load %arg8[%c1_86, %c0_87, %c0_88] : memref<12x36x32xf32, #tpu.memory_space<vmem>>, vector<1x36x32xf32>
    %89 = vector.shape_cast %88 : vector<1x36x32xf32> to vector<36x32xf32>
    %cst_89 = arith.constant dense<0.000000e+00> : vector<1x32xf32>
    %90 = tpu.matmul %87, %89, %cst_89 {dimension_numbers = #tpu.dot_dimension_numbers<[1], [0], [0], [1], [0, 0, 1, 1], [], []>} : vector<1x36xf32>, vector<36x32xf32>, vector<1x32xf32> -> vector<1x32xf32>
    %91 = arith.addf %86, %90 : vector<1x32xf32>
    %92 = vector.extract_strided_slice %75 {offsets = [2, 0], sizes = [1, 36], strides = [1, 1]} : vector<12x36xf32> to vector<1x36xf32>
    %c2_90 = arith.constant 2 : index
    %c0_91 = arith.constant 0 : index
    %c0_92 = arith.constant 0 : index
    %93 = vector.load %arg8[%c2_90, %c0_91, %c0_92] : memref<12x36x32xf32, #tpu.memory_space<vmem>>, vector<1x36x32xf32>
    %94 = vector.shape_cast %93 : vector<1x36x32xf32> to vector<36x32xf32>
    %cst_93 = arith.constant dense<0.000000e+00> : vector<1x32xf32>
    %95 = tpu.matmul %92, %94, %cst_93 {dimension_numbers = #tpu.dot_dimension_numbers<[1], [0], [0], [1], [0, 0, 1, 1], [], []>} : vector<1x36xf32>, vector<36x32xf32>, vector<1x32xf32> -> vector<1x32xf32>
    %96 = arith.addf %91, %95 : vector<1x32xf32>
    %97 = vector.extract_strided_slice %75 {offsets = [3, 0], sizes = [1, 36], strides = [1, 1]} : vector<12x36xf32> to vector<1x36xf32>
    %c3_94 = arith.constant 3 : index
    %c0_95 = arith.constant 0 : index
    %c0_96 = arith.constant 0 : index
    %98 = vector.load %arg8[%c3_94, %c0_95, %c0_96] : memref<12x36x32xf32, #tpu.memory_space<vmem>>, vector<1x36x32xf32>
    %99 = vector.shape_cast %98 : vector<1x36x32xf32> to vector<36x32xf32>
    %cst_97 = arith.constant dense<0.000000e+00> : vector<1x32xf32>
    %100 = tpu.matmul %97, %99, %cst_97 {dimension_numbers = #tpu.dot_dimension_numbers<[1], [0], [0], [1], [0, 0, 1, 1], [], []>} : vector<1x36xf32>, vector<36x32xf32>, vector<1x32xf32> -> vector<1x32xf32>
    %101 = arith.addf %96, %100 : vector<1x32xf32>
    %102 = vector.extract_strided_slice %75 {offsets = [4, 0], sizes = [1, 36], strides = [1, 1]} : vector<12x36xf32> to vector<1x36xf32>
    %c4_98 = arith.constant 4 : index
    %c0_99 = arith.constant 0 : index
    %c0_100 = arith.constant 0 : index
    %103 = vector.load %arg8[%c4_98, %c0_99, %c0_100] : memref<12x36x32xf32, #tpu.memory_space<vmem>>, vector<1x36x32xf32>
    %104 = vector.shape_cast %103 : vector<1x36x32xf32> to vector<36x32xf32>
    %cst_101 = arith.constant dense<0.000000e+00> : vector<1x32xf32>
    %105 = tpu.matmul %102, %104, %cst_101 {dimension_numbers = #tpu.dot_dimension_numbers<[1], [0], [0], [1], [0, 0, 1, 1], [], []>} : vector<1x36xf32>, vector<36x32xf32>, vector<1x32xf32> -> vector<1x32xf32>
    %106 = arith.addf %101, %105 : vector<1x32xf32>
    %107 = vector.extract_strided_slice %75 {offsets = [5, 0], sizes = [1, 36], strides = [1, 1]} : vector<12x36xf32> to vector<1x36xf32>
    %c5_102 = arith.constant 5 : index
    %c0_103 = arith.constant 0 : index
    %c0_104 = arith.constant 0 : index
    %108 = vector.load %arg8[%c5_102, %c0_103, %c0_104] : memref<12x36x32xf32, #tpu.memory_space<vmem>>, vector<1x36x32xf32>
    %109 = vector.shape_cast %108 : vector<1x36x32xf32> to vector<36x32xf32>
    %cst_105 = arith.constant dense<0.000000e+00> : vector<1x32xf32>
    %110 = tpu.matmul %107, %109, %cst_105 {dimension_numbers = #tpu.dot_dimension_numbers<[1], [0], [0], [1], [0, 0, 1, 1], [], []>} : vector<1x36xf32>, vector<36x32xf32>, vector<1x32xf32> -> vector<1x32xf32>
    %111 = arith.addf %106, %110 : vector<1x32xf32>
    %112 = vector.extract_strided_slice %75 {offsets = [6, 0], sizes = [1, 36], strides = [1, 1]} : vector<12x36xf32> to vector<1x36xf32>
    %c6_106 = arith.constant 6 : index
    %c0_107 = arith.constant 0 : index
    %c0_108 = arith.constant 0 : index
    %113 = vector.load %arg8[%c6_106, %c0_107, %c0_108] : memref<12x36x32xf32, #tpu.memory_space<vmem>>, vector<1x36x32xf32>
    %114 = vector.shape_cast %113 : vector<1x36x32xf32> to vector<36x32xf32>
    %cst_109 = arith.constant dense<0.000000e+00> : vector<1x32xf32>
    %115 = tpu.matmul %112, %114, %cst_109 {dimension_numbers = #tpu.dot_dimension_numbers<[1], [0], [0], [1], [0, 0, 1, 1], [], []>} : vector<1x36xf32>, vector<36x32xf32>, vector<1x32xf32> -> vector<1x32xf32>
    %116 = arith.addf %111, %115 : vector<1x32xf32>
    %117 = vector.extract_strided_slice %75 {offsets = [7, 0], sizes = [1, 36], strides = [1, 1]} : vector<12x36xf32> to vector<1x36xf32>
    %c7_110 = arith.constant 7 : index
    %c0_111 = arith.constant 0 : index
    %c0_112 = arith.constant 0 : index
    %118 = vector.load %arg8[%c7_110, %c0_111, %c0_112] : memref<12x36x32xf32, #tpu.memory_space<vmem>>, vector<1x36x32xf32>
    %119 = vector.shape_cast %118 : vector<1x36x32xf32> to vector<36x32xf32>
    %cst_113 = arith.constant dense<0.000000e+00> : vector<1x32xf32>
    %120 = tpu.matmul %117, %119, %cst_113 {dimension_numbers = #tpu.dot_dimension_numbers<[1], [0], [0], [1], [0, 0, 1, 1], [], []>} : vector<1x36xf32>, vector<36x32xf32>, vector<1x32xf32> -> vector<1x32xf32>
    %121 = arith.addf %116, %120 : vector<1x32xf32>
    %122 = vector.extract_strided_slice %75 {offsets = [8, 0], sizes = [1, 36], strides = [1, 1]} : vector<12x36xf32> to vector<1x36xf32>
    %c8_114 = arith.constant 8 : index
    %c0_115 = arith.constant 0 : index
    %c0_116 = arith.constant 0 : index
    %123 = vector.load %arg8[%c8_114, %c0_115, %c0_116] : memref<12x36x32xf32, #tpu.memory_space<vmem>>, vector<1x36x32xf32>
    %124 = vector.shape_cast %123 : vector<1x36x32xf32> to vector<36x32xf32>
    %cst_117 = arith.constant dense<0.000000e+00> : vector<1x32xf32>
    %125 = tpu.matmul %122, %124, %cst_117 {dimension_numbers = #tpu.dot_dimension_numbers<[1], [0], [0], [1], [0, 0, 1, 1], [], []>} : vector<1x36xf32>, vector<36x32xf32>, vector<1x32xf32> -> vector<1x32xf32>
    %126 = arith.addf %121, %125 : vector<1x32xf32>
    %127 = vector.extract_strided_slice %75 {offsets = [9, 0], sizes = [1, 36], strides = [1, 1]} : vector<12x36xf32> to vector<1x36xf32>
    %c9 = arith.constant 9 : index
    %c0_118 = arith.constant 0 : index
    %c0_119 = arith.constant 0 : index
    %128 = vector.load %arg8[%c9, %c0_118, %c0_119] : memref<12x36x32xf32, #tpu.memory_space<vmem>>, vector<1x36x32xf32>
    %129 = vector.shape_cast %128 : vector<1x36x32xf32> to vector<36x32xf32>
    %cst_120 = arith.constant dense<0.000000e+00> : vector<1x32xf32>
    %130 = tpu.matmul %127, %129, %cst_120 {dimension_numbers = #tpu.dot_dimension_numbers<[1], [0], [0], [1], [0, 0, 1, 1], [], []>} : vector<1x36xf32>, vector<36x32xf32>, vector<1x32xf32> -> vector<1x32xf32>
    %131 = arith.addf %126, %130 : vector<1x32xf32>
    %132 = vector.extract_strided_slice %75 {offsets = [10, 0], sizes = [1, 36], strides = [1, 1]} : vector<12x36xf32> to vector<1x36xf32>
    %c10 = arith.constant 10 : index
    %c0_121 = arith.constant 0 : index
    %c0_122 = arith.constant 0 : index
    %133 = vector.load %arg8[%c10, %c0_121, %c0_122] : memref<12x36x32xf32, #tpu.memory_space<vmem>>, vector<1x36x32xf32>
    %134 = vector.shape_cast %133 : vector<1x36x32xf32> to vector<36x32xf32>
    %cst_123 = arith.constant dense<0.000000e+00> : vector<1x32xf32>
    %135 = tpu.matmul %132, %134, %cst_123 {dimension_numbers = #tpu.dot_dimension_numbers<[1], [0], [0], [1], [0, 0, 1, 1], [], []>} : vector<1x36xf32>, vector<36x32xf32>, vector<1x32xf32> -> vector<1x32xf32>
    %136 = arith.addf %131, %135 : vector<1x32xf32>
    %137 = vector.extract_strided_slice %75 {offsets = [11, 0], sizes = [1, 36], strides = [1, 1]} : vector<12x36xf32> to vector<1x36xf32>
    %c11 = arith.constant 11 : index
    %c0_124 = arith.constant 0 : index
    %c0_125 = arith.constant 0 : index
    %138 = vector.load %arg8[%c11, %c0_124, %c0_125] : memref<12x36x32xf32, #tpu.memory_space<vmem>>, vector<1x36x32xf32>
    %139 = vector.shape_cast %138 : vector<1x36x32xf32> to vector<36x32xf32>
    %cst_126 = arith.constant dense<0.000000e+00> : vector<1x32xf32>
    %140 = tpu.matmul %137, %139, %cst_126 {dimension_numbers = #tpu.dot_dimension_numbers<[1], [0], [0], [1], [0, 0, 1, 1], [], []>} : vector<1x36xf32>, vector<36x32xf32>, vector<1x32xf32> -> vector<1x32xf32>
    %141 = arith.addf %136, %140 : vector<1x32xf32>
    %cst_127 = arith.constant 0.000000e+00 : f32
    %142 = vector.broadcast %cst_127 : f32 to vector<1x32xf32>
    %143 = arith.maximumf %141, %142 : vector<1x32xf32>
    %c0_128 = arith.constant 0 : index
    %c0_129 = arith.constant 0 : index
    %144 = vector.load %arg11[%c0_128, %c0_129] : memref<32x32xf32, #tpu.memory_space<vmem>>, vector<32x32xf32>
    %cst_130 = arith.constant dense<0.000000e+00> : vector<1x32xf32>
    %145 = tpu.matmul %143, %144, %cst_130 {dimension_numbers = #tpu.dot_dimension_numbers<[1], [0], [0], [1], [0, 0, 1, 1], [], []>} : vector<1x32xf32>, vector<32x32xf32>, vector<1x32xf32> -> vector<1x32xf32>
    %c0_131 = arith.constant 0 : index
    %c0_132 = arith.constant 0 : index
    %146 = vector.load %arg12[%c0_131, %c0_132] : memref<1x32xf32, #tpu.memory_space<vmem>>, vector<1x32xf32>
    %147 = arith.addf %145, %146 : vector<1x32xf32>
    %cst_133 = arith.constant 0.000000e+00 : f32
    %148 = vector.broadcast %cst_133 : f32 to vector<1x32xf32>
    %149 = arith.maximumf %147, %148 : vector<1x32xf32>
    %c0_134 = arith.constant 0 : index
    %c0_135 = arith.constant 0 : index
    %150 = vector.load %arg13[%c0_134, %c0_135] : memref<1x32xf32, #tpu.memory_space<vmem>>, vector<1x32xf32>
    %151 = arith.mulf %149, %150 : vector<1x32xf32>
    %cst_136 = arith.constant dense<0.000000e+00> : vector<1xf32>
    %152 = vector.multi_reduction <add>, %151, %cst_136 [1] : vector<1x32xf32> to vector<1xf32>
    %153 = vector.shape_cast %152 : vector<1xf32> to vector<1x1xf32>
    %c0_137 = arith.constant 0 : index
    %c0_138 = arith.constant 0 : index
    %154 = vector.load %arg14[%c0_137, %c0_138] : memref<1x1xf32, #tpu.memory_space<vmem>>, vector<1x1xf32>
    %155 = arith.addf %153, %154 : vector<1x1xf32>
    %c0_139 = arith.constant 0 : index
    %c0_140 = arith.constant 0 : index
    %c0_141 = arith.constant 0 : index
    %156 = vector.load %arg15[%c0_139, %c0_140, %c0_141] : memref<1x1x1xf32, #tpu.memory_space<vmem>>, vector<1x1x1xf32>
    %157 = vector.shape_cast %156 : vector<1x1x1xf32> to vector<1x1xf32>
    %158 = vector.shape_cast %155 : vector<1x1xf32> to vector<1x1x1xf32>
    tpu.vector_store %arg15[%c0_139, %c0_140, %c0_141], %158 {strides = array<i32>} : memref<1x1x1xf32, #tpu.memory_space<vmem>>, vector<1x1x1xf32>,
    return
  }
  func.func @transform_0(%arg0: i32) -> (i32, i32, i32) {
    %c0_i32 = arith.constant 0 : i32
    %c0_i32_0 = arith.constant 0 : i32
    %c0_i32_1 = arith.constant 0 : i32
    return %arg0, %c0_i32, %c0_i32_0 : i32, i32, i32
  }
  func.func @transform_1(%arg0: i32) -> (i32, i32, i32) {
    %c0_i32 = arith.constant 0 : i32
    %c0_i32_0 = arith.constant 0 : i32
    %c0_i32_1 = arith.constant 0 : i32
    return %arg0, %c0_i32, %c0_i32_0 : i32, i32, i32
  }
  func.func @transform_2(%arg0: i32) -> (i32, i32) {
    %c0_i32 = arith.constant 0 : i32
    %c0_i32_0 = arith.constant 0 : i32
    %c0_i32_1 = arith.constant 0 : i32
    return %c0_i32, %c0_i32_0 : i32, i32
  }
  func.func @transform_3(%arg0: i32) -> (i32, i32) {
    %c0_i32 = arith.constant 0 : i32
    %c0_i32_0 = arith.constant 0 : i32
    %c0_i32_1 = arith.constant 0 : i32
    return %c0_i32, %c0_i32_0 : i32, i32
  }
  func.func @transform_4(%arg0: i32) -> (i32, i32, i32) {
    %c0_i32 = arith.constant 0 : i32
    %c0_i32_0 = arith.constant 0 : i32
    %c0_i32_1 = arith.constant 0 : i32
    %c0_i32_2 = arith.constant 0 : i32
    return %c0_i32, %c0_i32_0, %c0_i32_1 : i32, i32, i32
  }
  func.func @transform_5(%arg0: i32) -> (i32, i32, i32) {
    %c0_i32 = arith.constant 0 : i32
    %c0_i32_0 = arith.constant 0 : i32
    %c0_i32_1 = arith.constant 0 : i32
    %c0_i32_2 = arith.constant 0 : i32
    return %c0_i32, %c0_i32_0, %c0_i32_1 : i32, i32, i32
  }
  func.func @transform_6(%arg0: i32) -> (i32, i32) {
    %c0_i32 = arith.constant 0 : i32
    %c0_i32_0 = arith.constant 0 : i32
    %c0_i32_1 = arith.constant 0 : i32
    return %c0_i32, %c0_i32_0 : i32, i32
  }
  func.func @transform_7(%arg0: i32) -> (i32, i32, i32) {
    %c0_i32 = arith.constant 0 : i32
    %c0_i32_0 = arith.constant 0 : i32
    %c0_i32_1 = arith.constant 0 : i32
    %c0_i32_2 = arith.constant 0 : i32
    return %c0_i32, %c0_i32_0, %c0_i32_1 : i32, i32, i32
  }
  func.func @transform_8(%arg0: i32) -> (i32, i32) {
    %c0_i32 = arith.constant 0 : i32
    %c0_i32_0 = arith.constant 0 : i32
    %c0_i32_1 = arith.constant 0 : i32
    return %c0_i32, %c0_i32_0 : i32, i32
  }
  func.func @transform_9(%arg0: i32) -> (i32, i32) {
    %c0_i32 = arith.constant 0 : i32
    %c0_i32_0 = arith.constant 0 : i32
    %c0_i32_1 = arith.constant 0 : i32
    return %c0_i32, %c0_i32_0 : i32, i32
  }
  func.func @transform_10(%arg0: i32) -> (i32, i32) {
    %c0_i32 = arith.constant 0 : i32
    %c0_i32_0 = arith.constant 0 : i32
    %c0_i32_1 = arith.constant 0 : i32
    return %c0_i32, %c0_i32_0 : i32, i32
  }
  func.func @transform_11(%arg0: i32) -> (i32, i32) {
    %c0_i32 = arith.constant 0 : i32
    %c0_i32_0 = arith.constant 0 : i32
    %c0_i32_1 = arith.constant 0 : i32
    return %c0_i32, %c0_i32_0 : i32, i32
  }
  func.func @transform_12(%arg0: i32) -> (i32, i32) {
    %c0_i32 = arith.constant 0 : i32
    %c0_i32_0 = arith.constant 0 : i32
    %c0_i32_1 = arith.constant 0 : i32
    return %c0_i32, %c0_i32_0 : i32, i32
  }
  func.func @transform_13(%arg0: i32) -> (i32, i32) {
    %c0_i32 = arith.constant 0 : i32
    %c0_i32_0 = arith.constant 0 : i32
    %c0_i32_1 = arith.constant 0 : i32
    return %c0_i32, %c0_i32_0 : i32, i32
  }
  func.func @transform_14(%arg0: i32) -> (i32, i32, i32) {
    %c0_i32 = arith.constant 0 : i32
    %c0_i32_0 = arith.constant 0 : i32
    %c0_i32_1 = arith.constant 0 : i32
    return %arg0, %c0_i32, %c0_i32_0 : i32, i32, i32
  }
}

</mosaic_0001>

<bundles_post_ra>
// kernel: q_cnn_net_forward.1
= control target key start
LH: loop header
LB: loop body
LE: loop exit
PB: predicated region body
PF: predicated region fallthrough
CT: control target
= control target key end

     0   :  { %s4644_s15 = smov 0   ;;  %s5825_s0 = inlined_call_operand.vmem [shape: f32[2,27,169], index: 0, kind: input, shape index: {}]   ;;  %s5826_s1 = inlined_call_operand.vmem [shape: f32[2,1,4], index: 1, kind: input, shape index: {}]   ;;  %s5827_s2 = inlined_call_operand.vmem [shape: f32[8,27], index: 2, kind: input, shape index: {}]   ;;  %s5828_s3 = inlined_call_operand.vmem [shape: f32[8,1], index: 3, kind: input, shape index: {}]   ;;  %s5829_s4 = inlined_call_operand.vmem [shape: f32[9,169,36], index: 4, kind: input, shape index: {}]   ;;  %s5830_s5 = inlined_call_operand.vmem [shape: f32[9,12,8], index: 5, kind: input, shape index: {}]   ;;  %s5831_s6 = inlined_call_operand.vmem [shape: f32[12,1], index: 6, kind: input, shape index: {}]   ;;  %s5832_s7 = inlined_call_operand.vmem [shape: f32[12,36,32], index: 7, kind: input, shape index: {}]   ;;  %s5833_s8 = inlined_call_operand.vmem [shape: f32[4,32], index: 8, kind: input, shape index: {}]   ;;  %s5834_s9 = inlined_call_operand.vmem [shape: f32[1,32], index: 9, kind: input, shape index: {}]   ;;  %s5835_s10 = inlined_call_operand.vmem [shape: f32[32,32], index: 10, kind: input, shape index: {}]   ;;  %s5836_s11 = inlined_call_operand.vmem [shape: f32[1,32], index: 11, kind: input, shape index: {}]   ;;  %s5837_s12 = inlined_call_operand.vmem [shape: f32[1,32], index: 12, kind: input, shape index: {}]   ;;  %s5838_s13 = inlined_call_operand.<no memory space> [shape: f32[1,1], index: 13, kind: input, shape index: {}]   ;;  %s5839_s14 = inlined_call_operand.vmem [shape: f32[2,1,1], index: 14, kind: output, shape index: {}]  }
   0x1   :  { %v19_v0 = vstv %s5838_s13 }
   0x2   :  { %20 = vst [vmem:[#allocation2] sm:$0x1] %v19_v0 }
   0x3 LB: > { %s3457_s16 = sadd.s32 4294967295, %s4559_s15   ;;  %p3461_p0 = scmp.ge.s32.totalorder %s4559_s15, 1  ;;  %s4559_s15 = sphi %s4644_s15, %s26_s15  }
   0x4   : > { %p422_p1 = scmp.lt.s32.totalorder %s4559_s15, 3 }
   0x6   : > { %p423_p2 = pnand %p3461_p0, %p422_p1 }
   0x7   : > { %p469_p3 = scmp.lt.s32.totalorder (!%p423_p2), %s3457_s16, 1  ;;  %v4561_v1 = vmov (!%p423_p2), 0.0   ;;  %v489_v2 = vld [vmem:[%s5828_s3] sm:$0xff] (!%p423_p2)  ;;  %v4562_v3 = vmov (!%p423_p2), 0   ;;  %vm499_vm0 = vcmask (!%p423_p2), 1042432   ;;  %vm4563_vm1 = vmmov (!%p423_p2), 1  }
   0x8   : > { %426 = sbr.rel (%p423_p2) target bundleno = 2470 (0x9a6), region = 76  ;;  %570 = vmatprep.mubr.f32.mxu0 (!%p423_p2), %v4561_v1  ;;  %4551 = vset.pattern.permute.xlu0 (!%p423_p2), %v4562_v3  ;;  %v2217_v4 = vld [vmem:[%s5831_s6] sm:$0xff] (!%p423_p2)  ;;  %vm4108_vm2 = vmpackc.low (!%p423_p2), %vm499_vm0, %vm4563_vm1  ;;  %v580_v18 = vld [vmem:[%s5829_s4 + $0x8] sm:$0xff] (!%p423_p2)  ;;  %vm495_vm3 = vcmask (!%p423_p2), 220160   ;;  %v4564_v21 = vmov (!%p423_p2), 0.0|0.0   ;;  %vm605_vm4 = vcmask (!%p423_p2), 1040384  }
   0x9   : > { %4552 = vset.pattern.permute.xlu1 (!%p423_p2), %v4562_v3  ;;  %492 = vperm.xlu0 (!%p423_p2), %4551, %v489_v2   ;;  %v579_v17 = vld [vmem:[%s5829_s4] sm:$0xff] (!%p423_p2)  ;;  %v581_v22 = vld [vmem:[%s5829_s4 + $0x10] sm:$0xff] (!%p423_p2)  ;;  %v582_v23 = vld [vmem:[%s5829_s4 + $0x18] sm:$0xff] (!%p423_p2)  ;;  %vm601_vm6 = vcmask (!%p423_p2), 334848   ;;  %vm780_vm7 = vcmask (!%p423_p2), 64512   ;;  %vm4565_vm8 = vmmov (!%p423_p2), 0  }
   0xa   : > { %v488_v19 = vld [vmem:[%s5827_s2] sm:$0xff] (!%p423_p2)  ;;  %v4114_v20 = vpack.c.bf16 (!%p423_p2), %v580_v18, %v579_v17  ;;  %v4117_v24 = vpack.c.bf16 (!%p423_p2), %v582_v23, %v581_v22  ;;  %v584_v26 = vld [vmem:[%s5829_s4 + $0x28] sm:$0xff] (!%p423_p2)  ;;  %v585_v28 = vld [vmem:[%s5829_s4 + $0x30] sm:$0xff] (!%p423_p2)  ;;  %vm2240_vm9 = vcmask (!%p423_p2), 1043456   ;;  %vm2236_vm10 = vcmask (!%p423_p2), 31744  }
   0xb   : > { %v583_v25 = vld [vmem:[%s5829_s4 + $0x20] sm:$0xff] (!%p423_p2)  ;;  %v586_v29 = vld [vmem:[%s5829_s4 + $0x38] sm:$0xff] (!%p423_p2)  ;;  %v588_v32 = vld [vmem:[%s5829_s4 + $0x48] sm:$0xff] (!%p423_p2)  ;;  %vm2319_vm11 = vcmask (!%p423_p2), 293888   ;;  %vm3316_vm12 = vcmask (!%p423_p2), 261120   ;;  %vm3393_vm13 = vcmask (!%p423_p2), 253952  }
   0xc   : > { %v4120_v27 = vpack.c.bf16 (!%p423_p2), %v584_v26, %v583_v25  ;;  %v4123_v30 = vpack.c.bf16 (!%p423_p2), %v586_v29, %v585_v28  ;;  %v587_v31 = vld [vmem:[%s5829_s4 + $0x40] sm:$0xff] (!%p423_p2)  ;;  %v589_v34 = vld [vmem:[%s5829_s4 + $0x50] sm:$0xff] (!%p423_p2)  ;;  %v590_v35 = vld [vmem:[%s5829_s4 + $0x58] sm:$0xff] (!%p423_p2)  ;;  %vm3399_vm14 = vcmask (!%p423_p2), 0  }
   0xd   : > { %2221 = vperm.xlu0 (!%p423_p2), %4551, %v2217_v4   ;;  %v4126_v33 = vpack.c.bf16 (!%p423_p2), %v588_v32, %v587_v31  ;;  %v4129_v36 = vpack.c.bf16 (!%p423_p2), %v590_v35, %v589_v34  ;;  %v591_v37 = vld [vmem:[%s5829_s4 + $0x60] sm:$0xff] (!%p423_p2)  ;;  %v592_v38 = vld [vmem:[%s5829_s4 + $0x68] sm:$0xff] (!%p423_p2)  ;;  %v593_v40 = vld [vmem:[%s5829_s4 + $0x70] sm:$0xff] (!%p423_p2) }
   0xe   : > { %v4132_v39 = vpack.c.bf16 (!%p423_p2), %v592_v38, %v591_v37  ;;  %v594_v41 = vld [vmem:[%s5829_s4 + $0x78] sm:$0xff] (!%p423_p2)  ;;  %v595_v43 = vld [vmem:[%s5829_s4 + $0x80] sm:$0xff] (!%p423_p2)  ;;  %v596_v44 = vld [vmem:[%s5829_s4 + $0x88] sm:$0xff] (!%p423_p2) }
   0xf   : > { %s5843_s16 = smov (!%p469_p3, %s3457_s16), 1  ;;  %v4135_v42 = vpack.c.bf16 %v594_v41, %v593_v40  ;;  %v4138_v45 = vpack.c.bf16 %v596_v44, %v595_v43  ;;  %v597_v46 = vld [vmem:[%s5829_s4 + $0x90] sm:$0xff]  ;;  %v598_v47 = vld [vmem:[%s5829_s4 + $0x98] sm:$0xff]  ;;  %vm4741_vm5 = vmpackc.low %vm605_vm4, %vm4563_vm1 }
  0x10   : > { %s3779_s18 = sshll.u32 %s5843_s16, 6  ;;  %v4141_v48 = vpack.c.bf16 %v598_v47, %v597_v46  ;;  %v599_v50 = vld [vmem:[%s5829_s4 + $0xa0] sm:$0xff]  ;;  %v600_v51 = vld [vmem:[%s5829_s4 + $0xa8] sm:$0x1]  ;;  %v3469_v57 = vld [vmem:[%s5829_s4 + $0xb0] sm:$0xff]  ;;  %s476_s29 = scalar_lea.vmem %s5826_s1, %s5843_s16 }
  0x11   : > { %s473_s23 = scalar_lea.vmem %s5825_s0, %s3779_s18  ;;  %v4144_v52 = vpack.c.bf16 %v600_v51, %v599_v50  ;;  %v3470_v58 = vld [vmem:[%s5829_s4 + $0xb8] sm:$0xff]  ;;  %v3471_v63 = vld [vmem:[%s5829_s4 + $0xc0] sm:$0xff]  ;;  %v3472_v0 = vld [vmem:[%s5829_s4 + $0xc8] sm:$0xff]  ;;  %s479_s13 = scalar_lea.vmem %s5839_s14, %s5843_s16 }
  0x12   : > { %v481_v5 = vld [vmem:[%s473_s23 + $0x8] sm:$0xff]  ;;  %v483_v6 = vld [vmem:[%s473_s23 + $0x18] sm:$0xff]  ;;  %v480_v7 = vld [vmem:[%s473_s23] sm:$0xff]  ;;  %v4148_v61 = vpack.c.bf16 %v3470_v58, %v3469_v57  ;;  %v4151_v2 = vpack.c.bf16 %v3472_v0, %v3471_v63 }
  0x13   : > { %v4103_v8 = vpack.c.bf16 %v483_v6, %v481_v5  ;;  %v482_v9 = vld [vmem:[%s473_s23 + $0x10] sm:$0xff]  ;;  %v485_v10 = vld [vmem:[%s473_s23 + $0x28] sm:$0xff]  ;;  %v487_v11 = vld [vmem:[%s473_s23 + $0x38] sm:$0x7] }
  0x14   : > { %v4105_v12 = vpack.c.bf16 %v482_v9, %v480_v7  ;;  %v4107_v13 = vpack.c.bf16 %v487_v11, %v485_v10  ;;  %v484_v14 = vld [vmem:[%s473_s23 + $0x20] sm:$0xff]  ;;  %v486_v15 = vld [vmem:[%s473_s23 + $0x30] sm:$0x7]  ;;  %v3474_v4 = vld [vmem:[%s5829_s4 + $0xd8] sm:$0xff] }
  0x15   : > { %4104 = vmatprep.subr.bf16.mxu0 %v4103_v8  ;;  %v4110_v16 = vpack.c.bf16 %v486_v15, %v484_v14  ;;  %v3473_v3 = vld [vmem:[%s5829_s4 + $0xd0] sm:$0xff]  ;;  %v3475_v6 = vld [vmem:[%s5829_s4 + $0xe0] sm:$0xff]  ;;  %v3476_v7 = vld [vmem:[%s5829_s4 + $0xe8] sm:$0xff] }
  0x16   : > { %4106 = vmatpush1.bf16.msra.mxu0 %v4105_v12  ;;  %v4154_v5 = vpack.c.bf16 %v3474_v4, %v3473_v3  ;;  %v4157_v8 = vpack.c.bf16 %v3476_v7, %v3475_v6  ;;  %v3477_v9 = vld [vmem:[%s5829_s4 + $0xf0] sm:$0xff]  ;;  %v3478_v10 = vld [vmem:[%s5829_s4 + $0xf8] sm:$0xff]  ;;  %v3479_v12 = vld [vmem:[%s5829_s4 + $0x100] sm:$0xff] }
  0x17   : > { %4109 = vmatprep.subr.msk.bf16.mxu0 %vm4108_vm2, %v4107_v13  ;;  %v4160_v11 = vpack.c.bf16 %v3478_v10, %v3477_v9  ;;  %v3480_v13 = vld [vmem:[%s5829_s4 + $0x108] sm:$0xff]  ;;  %v3481_v15 = vld [vmem:[%s5829_s4 + $0x110] sm:$0xff]  ;;  %v3483_v18 = vld [vmem:[%s5829_s4 + $0x120] sm:$0xff] }
  0x18   : > { %v4163_v14 = vpack.c.bf16 %v3480_v13, %v3479_v12  ;;  %v3485_v22 = vld [vmem:[%s5829_s4 + $0x130] sm:$0xff]  ;;  %v3486_v23 = vld [vmem:[%s5829_s4 + $0x138] sm:$0xff]  ;;  %v3487_v25 = vld [vmem:[%s5829_s4 + $0x140] sm:$0xff] }
  0x19   : > { %v3488_v26 = vld [vmem:[%s5829_s4 + $0x148] sm:$0xff]  ;;  %v3489_v28 = vld [vmem:[%s5829_s4 + $0x150] sm:$0xff]  ;;  %v3490_v29 = vld [vmem:[%s5829_s4 + $0x158] sm:$0x1] }
  0x1a   : > { %4112 = vmatpush1.bf16.msk.msra.mxu0 %vm4108_vm2, %v4110_v16  ;;  %v3482_v16 = vld [vmem:[%s5829_s4 + $0x118] sm:$0xff]  ;;  %v3493_v31 = vld [vmem:[%s5830_s5 + $0x10] sm:$0xff]  ;;  %v3499_v34 = vld [vmem:[%s5829_s4 + $0x160] sm:$0xff] }
  0x1b   : > { %4113 = vmatprep.subr.bf16.mxu0 %v4564_v21  ;;  %v4166_v17 = vpack.c.bf16 %v3482_v16, %v3481_v15  ;;  %v3500_v35 = vld [vmem:[%s5829_s4 + $0x168] sm:$0xff]  ;;  %v3494_v37 = vld [vmem:[%s5830_s5 + $0x18] sm:$0xf]  ;;  %v3501_v40 = vld [vmem:[%s5829_s4 + $0x170] sm:$0xff] }
  0x1c   : > { %v4182_v38 = vpack.c.bf16 %v3500_v35, %v3499_v34  ;;  %v3502_v41 = vld [vmem:[%s5829_s4 + $0x178] sm:$0xff]  ;;  %v3503_v43 = vld [vmem:[%s5829_s4 + $0x180] sm:$0xff]  ;;  %v3504_v44 = vld [vmem:[%s5829_s4 + $0x188] sm:$0xff] }
  0x1d   : > { %3466 = vmatmul.mubr.msk.f32.vlgmr.msra.gmra.mrb[0].mxu0 %vm495_vm3, %v488_v19  ;;  %v3484_v19 = vld [vmem:[%s5829_s4 + $0x128] sm:$0xff]  ;;  %v3505_v46 = vld [vmem:[%s5829_s4 + $0x190] sm:$0xff]  ;;  %v3506_v47 = vld [vmem:[%s5829_s4 + $0x198] sm:$0xff] }
  0x1e   : > { %4115 = vmatpush1.bf16.msra.mxu0 %v4114_v20  ;;  %v4169_v20 = vpack.c.bf16 %v3484_v19, %v3483_v18  ;;  %v3507_v50 = vld [vmem:[%s5829_s4 + $0x1a0] sm:$0xff]  ;;  %v3508_v51 = vld [vmem:[%s5829_s4 + $0x1a8] sm:$0xff]  ;;  %v3517_v4 = vld [vmem:[%s5829_s4 + $0x1f0] sm:$0xff] }
  0x1f   : > { %4116 = vmatprep.subr.bf16.mxu0 %v4564_v21  ;;  %v3512_v57 = vld [vmem:[%s5829_s4 + $0x1c8] sm:$0xff]  ;;  %v3515_v0 = vld [vmem:[%s5829_s4 + $0x1e0] sm:$0xff]  ;;  %v3557_v13 = vld [vmem:[%s5829_s4 + $0x2d0] sm:$0xff] }
  0x20   : > { %v3519_v7 = vld [vmem:[%s5829_s4 + $0x200] sm:$0xff]  ;;  %v3561_v19 = vld [vmem:[%s5829_s4 + $0x2f0] sm:$0xff] }
  0x21   : > { %v3555_v10 = vld [vmem:[%s5829_s4 + $0x2c0] sm:$0xff] }
  0x22   : > { %4118 = vmatpush1.bf16.msra.mxu0 %v4117_v24  ;;  %v4172_v24 = vpack.c.bf16 %v3486_v23, %v3485_v22  ;;  %v3559_v16 = vld [vmem:[%s5829_s4 + $0x2e0] sm:$0xff] }
  0x23   : > { %4119 = vmatprep.subr.bf16.mxu0 %v4564_v21  ;;  %v3563_v23 = vld [vmem:[%s5829_s4 + $0x300] sm:$0xff] }
  0x24   : > { %v3571_v35 = vld [vmem:[%s5829_s4 + $0x340] sm:$0xff] }
  0x26   : > { %4121 = vmatpush1.bf16.msra.mxu0 %v4120_v27  ;;  %v4175_v27 = vpack.c.bf16 %v3488_v26, %v3487_v25  ;;  %v3565_v26 = vld [vmem:[%s5829_s4 + $0x310] sm:$0xff] }
  0x27   : > { %4122 = vmatprep.subr.bf16.mxu0 %v4564_v21 }
  0x2a   : > { %4124 = vmatpush1.bf16.msra.mxu0 %v4123_v30  ;;  %v4178_v30 = vpack.c.bf16 %v3490_v29, %v3489_v28  ;;  %v3567_v29 = vld [vmem:[%s5829_s4 + $0x320] sm:$0xff] }
  0x2b   : > { %4125 = vmatprep.subr.bf16.mxu0 %v4564_v21 }
  0x2e   : > { %4127 = vmatpush1.bf16.msra.mxu0 %v4126_v33 }
  0x2f   : > { %4128 = vmatprep.subr.bf16.mxu0 %v4564_v21 }
  0x32   : > { %4130 = vmatpush1.bf16.msra.mxu0 %v4129_v36 }
  0x33   : > { %4131 = vmatprep.subr.bf16.mxu0 %v4564_v21 }
  0x36   : > { %4133 = vmatpush1.bf16.msra.mxu0 %v4132_v39 }
  0x37   : > { %4134 = vmatprep.subr.bf16.mxu0 %v4564_v21 }
  0x3a   : > { %4136 = vmatpush1.bf16.msra.mxu0 %v4135_v42  ;;  %v4185_v42 = vpack.c.bf16 %v3502_v41, %v3501_v40  ;;  %v3575_v41 = vld [vmem:[%s5829_s4 + $0x360] sm:$0xff] }
  0x3b   : > { %4137 = vmatprep.subr.bf16.mxu0 %v4564_v21 }
  0x3e   : > { %4139 = vmatpush1.bf16.msra.mxu0 %v4138_v45  ;;  %v4188_v45 = vpack.c.bf16 %v3504_v44, %v3503_v43  ;;  %v3611_v44 = vld [vmem:[%s5829_s4 + $0x420] sm:$0xff] }
  0x3f   : > { %4140 = vmatprep.subr.bf16.mxu0 %v4564_v21 }
  0x42   : > { %4142 = vmatpush1.bf16.msra.mxu0 %v4141_v48  ;;  %v4191_v48 = vpack.c.bf16 %v3506_v47, %v3505_v46  ;;  %v679_v46 = vld [vmem:[%s5830_s5] sm:$0xff]  ;;  %v680_v47 = vld [vmem:[%s5830_s5 + $0x8] sm:$0xf] }
  0x43   : > { %4143 = vmatprep.subr.bf16.mxu0 %v4564_v21  ;;  %3893 = vmatprep.mubr.msk.f32.mxu1 %vm780_vm7, %v679_v46  ;;  %v3684_v46 = vld [vmem:[%s5829_s4 + $0x608] sm:$0xff] }
  0x46   : > { %4146 = vmatpush1.bf16.msk.msra.mxu0 %vm4741_vm5, %v4144_v52  ;;  %v4194_v52 = vpack.c.bf16 %v3508_v51, %v3507_v50  ;;  %v3613_v50 = vld [vmem:[%s5829_s4 + $0x430] sm:$0xff]  ;;  %v3614_v51 = vld [vmem:[%s5829_s4 + $0x438] sm:$0xff] }
  0x47   : > { %4147 = vmatprep.subr.bf16.mxu0 %v4564_v21 }
  0x88   : > { %v493_v53 = vpop.permute.xlu0 %492 }
  0xf0   : > { %v572_v54 = vpop.f32.mrb[0].mxu0 }
  0xf1   : > { %v573_v55 = vadd.f32 %v572_v54, %v493_v53  ;;  %v574_v56 = vpop.f32.mrb[1].mxu0  ;;  %v3510_v54 = vld [vmem:[%s5829_s4 + $0x1b8] sm:$0xff] }
  0xf2   : > { %v575_v59 = vadd.f32 %v574_v56, %v493_v53  ;;  %v3509_v53 = vld [vmem:[%s5829_s4 + $0x1b0] sm:$0xff]  ;;  %v3511_v56 = vld [vmem:[%s5829_s4 + $0x1c0] sm:$0xff] }
  0xf3   : > { %v4762_v62 = vmax.f32 %v573_v55, 0.0  ;;  %v4197_v55 = vpack.c.bf16 %v3510_v54, %v3509_v53  ;;  %v4200_v58 = vpack.c.bf16 %v3512_v57, %v3511_v56  ;;  %v3615_v53 = vld [vmem:[%s5829_s4 + $0x440] sm:$0xff]  ;;  %v3616_v54 = vld [vmem:[%s5829_s4 + $0x448] sm:$0xff]  ;;  %v3617_v56 = vld [vmem:[%s5829_s4 + $0x450] sm:$0xff] }
  0xf4   : > { %v4760_v60 = vmax.f32 %v575_v59, 0.0  ;;  %v3513_v59 = vld [vmem:[%s5829_s4 + $0x1d0] sm:$0xff]  ;;  %v3618_v57 = vld [vmem:[%s5829_s4 + $0x458] sm:$0xff] }
  0xf6   : > { %3468 = vmatprep.mubr.msk.f32.mxu0 %vm601_vm6, %v4760_v60 }
  0xf7   : > { %674 = vmatmul.mubr.f32.vlgmr.msra.gmra.mrb[2].mxu0 %v4762_v62 }
  0xf8   : > { %4149 = vmatpush1.bf16.msra.mxu0 %v4148_v61  ;;  %3492 = vmatprep.mubr.msk.f32.mxu0 %vm601_vm6, %v4760_v60  ;;  %v3514_v61 = vld [vmem:[%s5829_s4 + $0x1d8] sm:$0xff] }
  0xf9   : > { %4150 = vmatprep.subr.bf16.mxu0 %v4564_v21  ;;  %v4203_v63 = vpack.c.bf16 %v3514_v61, %v3513_v59  ;;  %v3619_v59 = vld [vmem:[%s5829_s4 + $0x460] sm:$0xff]  ;;  %v3620_v61 = vld [vmem:[%s5829_s4 + $0x468] sm:$0xff] }
  0xfc   : > { %4152 = vmatpush1.bf16.msra.mxu0 %v4151_v2  ;;  %v3516_v2 = vld [vmem:[%s5829_s4 + $0x1e8] sm:$0xff] }
  0xfd   : > { %4153 = vmatprep.subr.bf16.mxu0 %v4564_v21  ;;  %v4206_v3 = vpack.c.bf16 %v3516_v2, %v3515_v0  ;;  %v3621_v0 = vld [vmem:[%s5829_s4 + $0x470] sm:$0xff]  ;;  %v3622_v2 = vld [vmem:[%s5829_s4 + $0x478] sm:$0xff] }
 0x100   : > { %4155 = vmatpush1.bf16.msra.mxu0 %v4154_v5  ;;  %v3518_v5 = vld [vmem:[%s5829_s4 + $0x1f8] sm:$0xff] }
 0x101   : > { %4156 = vmatprep.subr.bf16.mxu0 %v4564_v21  ;;  %v4209_v6 = vpack.c.bf16 %v3518_v5, %v3517_v4  ;;  %v3623_v4 = vld [vmem:[%s5829_s4 + $0x480] sm:$0xff]  ;;  %v3624_v5 = vld [vmem:[%s5829_s4 + $0x488] sm:$0xff] }
 0x104   : > { %4158 = vmatpush1.bf16.msra.mxu0 %v4157_v8  ;;  %v3520_v8 = vld [vmem:[%s5829_s4 + $0x208] sm:$0x1] }
 0x105   : > { %4159 = vmatprep.subr.bf16.mxu0 %v4564_v21  ;;  %v4212_v9 = vpack.c.bf16 %v3520_v8, %v3519_v7  ;;  %v3625_v7 = vld [vmem:[%s5829_s4 + $0x490] sm:$0xff]  ;;  %v3626_v8 = vld [vmem:[%s5829_s4 + $0x498] sm:$0xff] }
 0x108   : > { %4161 = vmatpush1.bf16.msra.mxu0 %v4160_v11  ;;  %v3556_v11 = vld [vmem:[%s5829_s4 + $0x2c8] sm:$0xff] }
 0x109   : > { %4162 = vmatprep.subr.bf16.mxu0 %v4564_v21  ;;  %v4250_v12 = vpack.c.bf16 %v3556_v11, %v3555_v10  ;;  %v3627_v10 = vld [vmem:[%s5829_s4 + $0x4a0] sm:$0xff]  ;;  %v3628_v11 = vld [vmem:[%s5829_s4 + $0x4a8] sm:$0xff] }
 0x10c   : > { %4164 = vmatpush1.bf16.msra.mxu0 %v4163_v14  ;;  %v3558_v14 = vld [vmem:[%s5829_s4 + $0x2d8] sm:$0xff] }
 0x10d   : > { %4165 = vmatprep.subr.bf16.mxu0 %v4564_v21  ;;  %v4253_v15 = vpack.c.bf16 %v3558_v14, %v3557_v13  ;;  %v3629_v13 = vld [vmem:[%s5829_s4 + $0x4b0] sm:$0xff]  ;;  %v3630_v14 = vld [vmem:[%s5829_s4 + $0x4b8] sm:$0xff] }
 0x110   : > { %4167 = vmatpush1.bf16.msra.mxu0 %v4166_v17  ;;  %v3560_v17 = vld [vmem:[%s5829_s4 + $0x2e8] sm:$0xff] }
 0x111   : > { %4168 = vmatprep.subr.bf16.mxu0 %v4564_v21  ;;  %v4256_v18 = vpack.c.bf16 %v3560_v17, %v3559_v16  ;;  %v3631_v16 = vld [vmem:[%s5829_s4 + $0x4c0] sm:$0xff]  ;;  %v3632_v17 = vld [vmem:[%s5829_s4 + $0x4c8] sm:$0x1] }
 0x114   : > { %4170 = vmatpush1.bf16.msra.mxu0 %v4169_v20  ;;  %v3562_v20 = vld [vmem:[%s5829_s4 + $0x2f8] sm:$0xff] }
 0x115   : > { %4171 = vmatprep.subr.bf16.mxu0 %v4564_v21  ;;  %v4259_v22 = vpack.c.bf16 %v3562_v20, %v3561_v19  ;;  %v3667_v19 = vld [vmem:[%s5829_s4 + $0x580] sm:$0xff]  ;;  %v3668_v20 = vld [vmem:[%s5829_s4 + $0x588] sm:$0xff] }
 0x118   : > { %4173 = vmatpush1.bf16.msra.mxu0 %v4172_v24  ;;  %v3564_v24 = vld [vmem:[%s5829_s4 + $0x308] sm:$0xff] }
 0x119   : > { %4174 = vmatprep.subr.bf16.mxu0 %v4564_v21  ;;  %v4262_v25 = vpack.c.bf16 %v3564_v24, %v3563_v23  ;;  %v4386_v23 = vpack.c.bf16 %v3668_v20, %v3667_v19  ;;  %v3669_v24 = vld [vmem:[%s5829_s4 + $0x590] sm:$0xff]  ;;  %v3541_v20 = vld [vmem:[%s5829_s4 + $0x280] sm:$0xff] }
 0x11c   : > { %4176 = vmatpush1.bf16.msra.mxu0 %v4175_v27  ;;  %v3566_v27 = vld [vmem:[%s5829_s4 + $0x318] sm:$0xff] }
 0x11d   : > { %4177 = vmatprep.subr.bf16.mxu0 %v4564_v21  ;;  %v4265_v28 = vpack.c.bf16 %v3566_v27, %v3565_v26  ;;  %v3671_v27 = vld [vmem:[%s5829_s4 + $0x5a0] sm:$0xff] }
 0x120   : > { %4180 = vmatpush1.bf16.msk.msra.mxu0 %vm4741_vm5, %v4178_v30  ;;  %v3568_v30 = vld [vmem:[%s5829_s4 + $0x328] sm:$0xff] }
 0x123   : > { %772 = vmatmul.mubr.f32.vlgmr.msra.gmra.mrb[4].mxu0 %v4762_v62 }
 0x124   : > { %3888 = vmatprep.mubr.msk.f32.mxu0 %vm780_vm7, %v3493_v31  ;;  %v4268_v31 = vpack.c.bf16 %v3568_v30, %v3567_v29  ;;  %v3673_v30 = vld [vmem:[%s5829_s4 + $0x5b0] sm:$0xff] }
 0x1ca   : > { %v675_v32 = vpop.f32.mrb[2].mxu0 }
 0x1cb   : > { %v677_v33 = vpop.f32.mrb[3].mxu0  ;;  %3891 = vmatprep.subr.mxu1 %v675_v32 }
 0x1cc   : > { %3892 = vmatpush3.msra.mxu1 %v675_v32  ;;  %v3569_v32 = vld [vmem:[%s5829_s4 + $0x330] sm:$0xff]  ;;  %v3570_v33 = vld [vmem:[%s5829_s4 + $0x338] sm:$0xff] }
 0x1cd   : > { %v4271_v34 = vpack.c.bf16 %v3570_v33, %v3569_v32  ;;  %3894 = vmatmul.mubr.msk.f32.vlgmr.msra.gmra.mrb[0].mxu1 %vm780_vm7, %v680_v47  ;;  %v3675_v33 = vld [vmem:[%s5829_s4 + $0x5c0] sm:$0xff] }
 0x1f6   : > { %v773_v36 = vpop.f32.mrb[4].mxu0 }
 0x1f7   : > { %v775_v39 = vpop.f32.mrb[5].mxu0  ;;  %3886 = vmatprep.subr.mxu0 %v773_v36 }
 0x1f8   : > { %3887 = vmatpush3.msra.mxu0 %v773_v36  ;;  %v3572_v36 = vld [vmem:[%s5829_s4 + $0x348] sm:$0xff]  ;;  %v3574_v39 = vld [vmem:[%s5829_s4 + $0x358] sm:$0xff] }
 0x1f9   : > { %3889 = vmatmul.mubr.msk.f32.vlgmr.msra.gmra.mrb[6].mxu0 %vm780_vm7, %v3494_v37  ;;  %4181 = vmatprep.subr.bf16.mxu0 %v4564_v21  ;;  %v4274_v37 = vpack.c.bf16 %v3572_v36, %v3571_v35  ;;  %v3677_v36 = vld [vmem:[%s5829_s4 + $0x5d0] sm:$0xff] }
 0x1fa   : > { %4183 = vmatpush1.bf16.msra.mxu0 %v4182_v38  ;;  %3522 = vmatprep.mubr.msk.f32.mxu0 %vm601_vm6, %v4760_v60  ;;  %v3573_v38 = vld [vmem:[%s5829_s4 + $0x350] sm:$0xff] }
 0x1fb   : > { %4184 = vmatprep.subr.bf16.mxu0 %v4564_v21  ;;  %v4277_v40 = vpack.c.bf16 %v3574_v39, %v3573_v38  ;;  %v3679_v39 = vld [vmem:[%s5829_s4 + $0x5e0] sm:$0xff] }
 0x1fe   : > { %4186 = vmatpush1.bf16.msra.mxu0 %v4185_v42  ;;  %v3576_v42 = vld [vmem:[%s5829_s4 + $0x368] sm:$0x1] }
 0x1ff   : > { %4187 = vmatprep.subr.bf16.mxu0 %v4564_v21  ;;  %v4280_v43 = vpack.c.bf16 %v3576_v42, %v3575_v41  ;;  %v3681_v42 = vld [vmem:[%s5829_s4 + $0x5f0] sm:$0xff] }
 0x202   : > { %4189 = vmatpush1.bf16.msra.mxu0 %v4188_v45  ;;  %v3612_v45 = vld [vmem:[%s5829_s4 + $0x428] sm:$0xff] }
 0x203   : > { %4190 = vmatprep.subr.bf16.mxu0 %v4564_v21 }
 0x206   : > { %4192 = vmatpush1.bf16.msra.mxu0 %v4191_v48  ;;  %v4318_v48 = vpack.c.bf16 %v3612_v45, %v3611_v44  ;;  %v3683_v45 = vld [vmem:[%s5829_s4 + $0x600] sm:$0xff] }
 0x207   : > { %4193 = vmatprep.subr.bf16.mxu0 %v4564_v21  ;;  %v4410_v47 = vpack.c.bf16 %v3684_v46, %v3683_v45  ;;  %v3584_v45 = vld [vmem:[%s5829_s4 + $0x378] sm:$0xff]  ;;  %v3580_v46 = vld [vmem:[%s5830_s5 + $0x48] sm:$0xf] }
 0x20a   : > { %4195 = vmatpush1.bf16.msra.mxu0 %v4194_v52  ;;  %v4321_v52 = vpack.c.bf16 %v3614_v51, %v3613_v50  ;;  %v3686_v50 = vld [vmem:[%s5829_s4 + $0x618] sm:$0xff] }
 0x20b   : > { %4196 = vmatprep.subr.bf16.mxu0 %v4564_v21 }
 0x20e   : > { %4198 = vmatpush1.bf16.msra.mxu0 %v4197_v55  ;;  %v4324_v55 = vpack.c.bf16 %v3616_v54, %v3615_v53  ;;  %v3688_v53 = vld [vmem:[%s5829_s4 + $0x628] sm:$0x1] }
 0x20f   : > { %4199 = vmatprep.subr.bf16.mxu0 %v4564_v21 }
 0x212   : > { %4201 = vmatpush1.bf16.msra.mxu0 %v4200_v58  ;;  %v4327_v58 = vpack.c.bf16 %v3618_v57, %v3617_v56  ;;  %v3527_v57 = vld [vmem:[%s5829_s4 + $0x210] sm:$0xff] }
 0x213   : > { %4202 = vmatprep.subr.bf16.mxu0 %v4564_v21 }
 0x216   : > { %4204 = vmatpush1.bf16.msra.mxu0 %v4203_v63  ;;  %v4330_v63 = vpack.c.bf16 %v3620_v61, %v3619_v59  ;;  %v3524_v61 = vld [vmem:[%s5830_s5 + $0x28] sm:$0xf] }
 0x217   : > { %4205 = vmatprep.subr.bf16.mxu0 %v4564_v21 }
 0x21a   : > { %4207 = vmatpush1.bf16.msra.mxu0 %v4206_v3  ;;  %v4333_v3 = vpack.c.bf16 %v3622_v2, %v3621_v0  ;;  %v3529_v2 = vld [vmem:[%s5829_s4 + $0x220] sm:$0xff] }
 0x21b   : > { %4208 = vmatprep.subr.bf16.mxu0 %v4564_v21 }
 0x21e   : > { %4210 = vmatpush1.bf16.msra.mxu0 %v4209_v6  ;;  %v4336_v6 = vpack.c.bf16 %v3624_v5, %v3623_v4  ;;  %v3531_v5 = vld [vmem:[%s5829_s4 + $0x230] sm:$0xff] }
 0x21f   : > { %4211 = vmatprep.subr.bf16.mxu0 %v4564_v21 }
 0x222   : > { %4214 = vmatpush1.bf16.msk.msra.mxu0 %vm4741_vm5, %v4212_v9  ;;  %v4339_v9 = vpack.c.bf16 %v3626_v8, %v3625_v7  ;;  %v3533_v8 = vld [vmem:[%s5829_s4 + $0x240] sm:$0xff] }
 0x223   : > { %4249 = vmatprep.subr.bf16.mxu0 %v4564_v21 }
 0x225   : > { %1034 = vmatmul.mubr.f32.vlgmr.msra.gmra.mrb[8].mxu0 %v4762_v62 }
 0x226   : > { %4251 = vmatpush1.bf16.msra.mxu0 %v4250_v12  ;;  %3578 = vmatprep.mubr.msk.f32.mxu0 %vm601_vm6, %v4760_v60  ;;  %v4342_v12 = vpack.c.bf16 %v3628_v11, %v3627_v10  ;;  %v3535_v11 = vld [vmem:[%s5829_s4 + $0x250] sm:$0xff] }
 0x227   : > { %4252 = vmatprep.subr.bf16.mxu0 %v4564_v21 }
 0x22a   : > { %4254 = vmatpush1.bf16.msra.mxu0 %v4253_v15  ;;  %v4345_v15 = vpack.c.bf16 %v3630_v14, %v3629_v13  ;;  %v3537_v14 = vld [vmem:[%s5829_s4 + $0x260] sm:$0xff] }
 0x22b   : > { %4255 = vmatprep.subr.bf16.mxu0 %v4564_v21 }
 0x22e   : > { %4257 = vmatpush1.bf16.msra.mxu0 %v4256_v18  ;;  %v4348_v18 = vpack.c.bf16 %v3632_v17, %v3631_v16  ;;  %v3539_v17 = vld [vmem:[%s5829_s4 + $0x270] sm:$0xff] }
 0x22f   : > { %4258 = vmatprep.subr.bf16.mxu0 %v4564_v21 }
 0x232   : > { %4260 = vmatpush1.bf16.msra.mxu0 %v4259_v22  ;;  %v3523_v22 = vld [vmem:[%s5830_s5 + $0x20] sm:$0xff] }
 0x233   : > { %4261 = vmatprep.subr.bf16.mxu0 %v4564_v21  ;;  %3898 = vmatprep.mubr.msk.f32.mxu1 %vm780_vm7, %v3523_v22  ;;  %v3542_v22 = vld [vmem:[%s5829_s4 + $0x288] sm:$0xff] }
 0x236   : > { %4263 = vmatpush1.bf16.msra.mxu0 %v4262_v25  ;;  %v3670_v25 = vld [vmem:[%s5829_s4 + $0x598] sm:$0xff] }
 0x237   : > { %4264 = vmatprep.subr.bf16.mxu0 %v4564_v21  ;;  %v4389_v26 = vpack.c.bf16 %v3670_v25, %v3669_v24  ;;  %v3543_v24 = vld [vmem:[%s5829_s4 + $0x290] sm:$0xff]  ;;  %v3544_v25 = vld [vmem:[%s5829_s4 + $0x298] sm:$0xff] }
 0x23a   : > { %4266 = vmatpush1.bf16.msra.mxu0 %v4265_v28  ;;  %v3672_v28 = vld [vmem:[%s5829_s4 + $0x5a8] sm:$0xff] }
 0x23b   : > { %4267 = vmatprep.subr.bf16.mxu0 %v4564_v21  ;;  %v4392_v29 = vpack.c.bf16 %v3672_v28, %v3671_v27  ;;  %v3545_v27 = vld [vmem:[%s5829_s4 + $0x2a0] sm:$0xff]  ;;  %v3546_v28 = vld [vmem:[%s5829_s4 + $0x2a8] sm:$0xff] }
 0x23e   : > { %4269 = vmatpush1.bf16.msra.mxu0 %v4268_v31  ;;  %v3674_v31 = vld [vmem:[%s5829_s4 + $0x5b8] sm:$0xff] }
 0x23f   : > { %4270 = vmatprep.subr.bf16.mxu0 %v4564_v21  ;;  %v4395_v32 = vpack.c.bf16 %v3674_v31, %v3673_v30  ;;  %v3547_v30 = vld [vmem:[%s5829_s4 + $0x2b0] sm:$0xff]  ;;  %v3548_v31 = vld [vmem:[%s5829_s4 + $0x2b8] sm:$0x1] }
 0x242   : > { %4272 = vmatpush1.bf16.msra.mxu0 %v4271_v34  ;;  %v3676_v34 = vld [vmem:[%s5829_s4 + $0x5c8] sm:$0xff] }
 0x243   : > { %4273 = vmatprep.subr.bf16.mxu0 %v4564_v21  ;;  %v4398_v35 = vpack.c.bf16 %v3676_v34, %v3675_v33 }
 0x246   : > { %4275 = vmatpush1.bf16.msra.mxu0 %v4274_v37  ;;  %v3678_v37 = vld [vmem:[%s5829_s4 + $0x5d8] sm:$0xff] }
 0x247   : > { %4276 = vmatprep.subr.bf16.mxu0 %v4564_v21  ;;  %v4401_v38 = vpack.c.bf16 %v3678_v37, %v3677_v36  ;;  %v3551_v37 = vld [vmem:[%s5830_s5 + $0x30] sm:$0xff] }
 0x24a   : > { %4278 = vmatpush1.bf16.msra.mxu0 %v4277_v40  ;;  %v3680_v40 = vld [vmem:[%s5829_s4 + $0x5e8] sm:$0xff] }
 0x24b   : > { %4279 = vmatprep.subr.bf16.mxu0 %v4564_v21  ;;  %v4404_v41 = vpack.c.bf16 %v3680_v40, %v3679_v39 }
 0x24e   : > { %4282 = vmatpush1.bf16.msk.msra.mxu0 %vm4741_vm5, %v4280_v43  ;;  %v3682_v43 = vld [vmem:[%s5829_s4 + $0x5f8] sm:$0xff] }
 0x24f   : > { %4317 = vmatprep.subr.bf16.mxu0 %v4564_v21  ;;  %v4407_v44 = vpack.c.bf16 %v3682_v43, %v3681_v42  ;;  %v3579_v43 = vld [vmem:[%s5830_s5 + $0x40] sm:$0xff] }
 0x251   : > { %1398 = vmatmul.mubr.f32.vlgmr.msra.gmra.mrb[10].mxu0 %v4762_v62 }
 0x252   : > { %4319 = vmatpush1.bf16.msra.mxu0 %v4318_v48  ;;  %3634 = vmatprep.mubr.msk.f32.mxu0 %vm601_vm6, %v4760_v60  ;;  %v3685_v48 = vld [vmem:[%s5829_s4 + $0x610] sm:$0xff] }
 0x253   : > { %4320 = vmatprep.subr.bf16.mxu0 %v4564_v21  ;;  %v4413_v51 = vpack.c.bf16 %v3686_v50, %v3685_v48  ;;  %v3585_v48 = vld [vmem:[%s5829_s4 + $0x380] sm:$0xff]  ;;  %v3586_v50 = vld [vmem:[%s5829_s4 + $0x388] sm:$0xff] }
 0x256   : > { %4322 = vmatpush1.bf16.msra.mxu0 %v4321_v52  ;;  %v3687_v52 = vld [vmem:[%s5829_s4 + $0x620] sm:$0xff] }
 0x257   : > { %4323 = vmatprep.subr.bf16.mxu0 %v4564_v21  ;;  %v4416_v54 = vpack.c.bf16 %v3688_v53, %v3687_v52  ;;  %v3587_v52 = vld [vmem:[%s5829_s4 + $0x390] sm:$0xff]  ;;  %v3588_v53 = vld [vmem:[%s5829_s4 + $0x398] sm:$0xff] }
 0x25a   : > { %4325 = vmatpush1.bf16.msra.mxu0 %v4324_v55 }
 0x25b   : > { %4326 = vmatprep.subr.bf16.mxu0 %v4564_v21 }
 0x25e   : > { %4328 = vmatpush1.bf16.msra.mxu0 %v4327_v58  ;;  %v3528_v58 = vld [vmem:[%s5829_s4 + $0x218] sm:$0xff] }
 0x25f   : > { %4329 = vmatprep.subr.bf16.mxu0 %v4564_v21 }
 0x262   : > { %4331 = vmatpush1.bf16.msra.mxu0 %v4330_v63  ;;  %v4216_v63 = vpack.c.bf16 %v3528_v58, %v3527_v57  ;;  %v3589_v57 = vld [vmem:[%s5829_s4 + $0x3a0] sm:$0xff]  ;;  %v3590_v58 = vld [vmem:[%s5829_s4 + $0x3a8] sm:$0xff] }
 0x263   : > { %4332 = vmatprep.subr.bf16.mxu0 %v4564_v21 }
 0x266   : > { %4334 = vmatpush1.bf16.msra.mxu0 %v4333_v3  ;;  %v3530_v3 = vld [vmem:[%s5829_s4 + $0x228] sm:$0xff] }
 0x267   : > { %4335 = vmatprep.subr.bf16.mxu0 %v4564_v21  ;;  %v4219_v4 = vpack.c.bf16 %v3530_v3, %v3529_v2  ;;  %v3593_v2 = vld [vmem:[%s5829_s4 + $0x3c0] sm:$0xff]  ;;  %v3594_v3 = vld [vmem:[%s5829_s4 + $0x3c8] sm:$0xff] }
 0x26a   : > { %4337 = vmatpush1.bf16.msra.mxu0 %v4336_v6  ;;  %v3532_v6 = vld [vmem:[%s5829_s4 + $0x238] sm:$0xff] }
 0x26b   : > { %4338 = vmatprep.subr.bf16.mxu0 %v4564_v21  ;;  %v4222_v7 = vpack.c.bf16 %v3532_v6, %v3531_v5  ;;  %v3595_v5 = vld [vmem:[%s5829_s4 + $0x3d0] sm:$0xff]  ;;  %v3596_v6 = vld [vmem:[%s5829_s4 + $0x3d8] sm:$0xff] }
 0x26e   : > { %4340 = vmatpush1.bf16.msra.mxu0 %v4339_v9  ;;  %v3534_v9 = vld [vmem:[%s5829_s4 + $0x248] sm:$0xff] }
 0x26f   : > { %4341 = vmatprep.subr.bf16.mxu0 %v4564_v21  ;;  %v4225_v10 = vpack.c.bf16 %v3534_v9, %v3533_v8  ;;  %v3597_v8 = vld [vmem:[%s5829_s4 + $0x3e0] sm:$0xff]  ;;  %v3598_v9 = vld [vmem:[%s5829_s4 + $0x3e8] sm:$0xff] }
 0x272   : > { %4343 = vmatpush1.bf16.msra.mxu0 %v4342_v12  ;;  %v3536_v12 = vld [vmem:[%s5829_s4 + $0x258] sm:$0xff] }
 0x273   : > { %4344 = vmatprep.subr.bf16.mxu0 %v4564_v21  ;;  %v4228_v13 = vpack.c.bf16 %v3536_v12, %v3535_v11  ;;  %v3599_v11 = vld [vmem:[%s5829_s4 + $0x3f0] sm:$0xff]  ;;  %v3600_v12 = vld [vmem:[%s5829_s4 + $0x3f8] sm:$0xff] }
 0x276   : > { %4346 = vmatpush1.bf16.msra.mxu0 %v4345_v15  ;;  %v3538_v15 = vld [vmem:[%s5829_s4 + $0x268] sm:$0xff] }
 0x277   : > { %4347 = vmatprep.subr.bf16.mxu0 %v4564_v21  ;;  %v4231_v16 = vpack.c.bf16 %v3538_v15, %v3537_v14  ;;  %v3601_v14 = vld [vmem:[%s5829_s4 + $0x400] sm:$0xff]  ;;  %v3602_v15 = vld [vmem:[%s5829_s4 + $0x408] sm:$0xff] }
 0x27a   : > { %4350 = vmatpush1.bf16.msk.msra.mxu0 %vm4741_vm5, %v4348_v18  ;;  %v3540_v18 = vld [vmem:[%s5829_s4 + $0x278] sm:$0xff] }
 0x27b   : > { %4385 = vmatprep.subr.bf16.mxu0 %v4564_v21  ;;  %v4234_v19 = vpack.c.bf16 %v3540_v18, %v3539_v17  ;;  %v3603_v17 = vld [vmem:[%s5829_s4 + $0x410] sm:$0xff]  ;;  %v3604_v18 = vld [vmem:[%s5829_s4 + $0x418] sm:$0x1] }
 0x27d   : > { %1762 = vmatmul.mubr.f32.vlgmr.msra.gmra.mrb[12].mxu0 %v4762_v62 }
 0x27e   : > { %4387 = vmatpush1.bf16.msra.mxu0 %v4386_v23  ;;  %3690 = vmatprep.mubr.msk.f32.mxu0 %vm601_vm6, %v4760_v60  ;;  %v4237_v23 = vpack.c.bf16 %v3542_v22, %v3541_v20  ;;  %v3607_v20 = vld [vmem:[%s5830_s5 + $0x50] sm:$0xff] }
 0x27f   : > { %4388 = vmatprep.subr.bf16.mxu0 %v4564_v21 }
 0x282   : > { %4390 = vmatpush1.bf16.msra.mxu0 %v4389_v26  ;;  %v4240_v26 = vpack.c.bf16 %v3544_v25, %v3543_v24  ;;  %v3635_v25 = vld [vmem:[%s5830_s5 + $0x60] sm:$0xff] }
 0x283   : > { %4391 = vmatprep.subr.bf16.mxu0 %v4564_v21 }
 0x286   : > { %4393 = vmatpush1.bf16.msra.mxu0 %v4392_v29  ;;  %v4243_v29 = vpack.c.bf16 %v3546_v28, %v3545_v27  ;;  %v3640_v27 = vld [vmem:[%s5829_s4 + $0x4d8] sm:$0xff]  ;;  %v3636_v28 = vld [vmem:[%s5830_s5 + $0x68] sm:$0xf] }
 0x287   : > { %4394 = vmatprep.subr.bf16.mxu0 %v4564_v21 }
 0x28a   : > { %4396 = vmatpush1.bf16.msra.mxu0 %v4395_v32  ;;  %v4246_v32 = vpack.c.bf16 %v3548_v31, %v3547_v30  ;;  %v3641_v30 = vld [vmem:[%s5829_s4 + $0x4e0] sm:$0xff]  ;;  %v3642_v31 = vld [vmem:[%s5829_s4 + $0x4e8] sm:$0xff] }
 0x28b   : > { %4397 = vmatprep.subr.bf16.mxu0 %v4564_v21 }
 0x28e   : > { %4399 = vmatpush1.bf16.msra.mxu0 %v4398_v35 }
 0x28f   : > { %4400 = vmatprep.subr.bf16.mxu0 %v4564_v21 }
 0x292   : > { %4402 = vmatpush1.bf16.msra.mxu0 %v4401_v38 }
 0x293   : > { %4403 = vmatprep.subr.bf16.mxu0 %v4564_v21 }
 0x296   : > { %4405 = vmatpush1.bf16.msra.mxu0 %v4404_v41  ;;  %v3552_v41 = vld [vmem:[%s5830_s5 + $0x38] sm:$0xf] }
 0x297   : > { %4406 = vmatprep.subr.bf16.mxu0 %v4564_v21 }
 0x29a   : > { %4408 = vmatpush1.bf16.msra.mxu0 %v4407_v44  ;;  %v3583_v44 = vld [vmem:[%s5829_s4 + $0x370] sm:$0xff] }
 0x29b   : > { %4409 = vmatprep.subr.bf16.mxu0 %v4564_v21 }
 0x29e   : > { %4411 = vmatpush1.bf16.msra.mxu0 %v4410_v47  ;;  %v4284_v47 = vpack.c.bf16 %v3584_v45, %v3583_v44  ;;  %v3651_v45 = vld [vmem:[%s5829_s4 + $0x530] sm:$0xff] }
 0x29f   : > { %4412 = vmatprep.subr.bf16.mxu0 %v4564_v21 }
 0x2a2   : > { %4414 = vmatpush1.bf16.msra.mxu0 %v4413_v51  ;;  %v4287_v51 = vpack.c.bf16 %v3586_v50, %v3585_v48  ;;  %v3653_v48 = vld [vmem:[%s5829_s4 + $0x540] sm:$0xff]  ;;  %v3654_v50 = vld [vmem:[%s5829_s4 + $0x548] sm:$0xff] }
 0x2a3   : > { %4415 = vmatprep.subr.bf16.mxu0 %v4564_v21 }
 0x2a6   : > { %4418 = vmatpush1.bf16.msk.msra.mxu0 %vm4741_vm5, %v4416_v54  ;;  %v4290_v54 = vpack.c.bf16 %v3588_v53, %v3587_v52  ;;  %v3655_v52 = vld [vmem:[%s5829_s4 + $0x550] sm:$0xff]  ;;  %v3656_v53 = vld [vmem:[%s5829_s4 + $0x558] sm:$0xff] }
 0x2a7   : > { %4491 = vmatprep.subr.bf16.mxu0 %v4564_v21 }
 0x2a9   : > { %2126 = vmatmul.mubr.f32.vlgmr.msra.gmra.mrb[14].mxu0 %v4762_v62 }
 0x2aa   : > { %4100 = vmatprep.mubr.msk.f32.mxu0 %vm4565_vm8, %v4561_v1 }
 0x2cc   : > { %v5191_v55 = vpop.f32.mrb[6].mxu0 }
 0x2cd   : > { %v5193_v56 = vpop.f32.mrb[7].mxu0 }
 0x2f8   : > { %v1035_v59 = vpop.f32.mrb[8].mxu0 }
 0x2f9   : > { %v1037_v0 = vpop.f32.mrb[9].mxu0  ;;  %3896 = vmatprep.subr.mxu1 %v1035_v59 }
 0x2fa   : > { %3897 = vmatpush3.msra.mxu1 %v1035_v59  ;;  %v4293_v59 = vpack.c.bf16 %v3590_v58, %v3589_v57  ;;  %v3657_v57 = vld [vmem:[%s5829_s4 + $0x560] sm:$0xff]  ;;  %v3658_v58 = vld [vmem:[%s5829_s4 + $0x568] sm:$0xff] }
 0x2fb   : > { %3899 = vmatmul.mubr.msk.f32.vlgmr.msra.gmra.mrb[0].mxu1 %vm780_vm7, %v3524_v61  ;;  %4215 = vmatprep.subr.bf16.mxu1 %v4564_v21  ;;  %v3591_v61 = vld [vmem:[%s5829_s4 + $0x3b0] sm:$0xff] }
 0x2fc   : > { %4217 = vmatpush1.bf16.msra.mxu1 %v4216_v63  ;;  %3550 = vmatprep.mubr.msk.f32.mxu1 %vm601_vm6, %v4760_v60  ;;  %v3592_v63 = vld [vmem:[%s5829_s4 + $0x3b8] sm:$0xff] }
 0x2fd   : > { %4218 = vmatprep.subr.bf16.mxu1 %v4564_v21  ;;  %v4296_v0 = vpack.c.bf16 %v3592_v63, %v3591_v61  ;;  %v3659_v61 = vld [vmem:[%s5829_s4 + $0x570] sm:$0xff]  ;;  %v3660_v63 = vld [vmem:[%s5829_s4 + $0x578] sm:$0x1] }
 0x300   : > { %4220 = vmatpush1.bf16.msra.mxu1 %v4219_v4  ;;  %v4299_v4 = vpack.c.bf16 %v3594_v3, %v3593_v2  ;;  %v3663_v2 = vld [vmem:[%s5830_s5 + $0x70] sm:$0xff]  ;;  %v2218_v3 = vld [vmem:[%s5831_s6 + $0x8] sm:$0xf] }
 0x301   : > { %4221 = vmatprep.subr.bf16.mxu1 %v4564_v21  ;;  %2226 = vperm.xlu1 %4552, %v2218_v3  }
 0x304   : > { %4223 = vmatpush1.bf16.msra.mxu1 %v4222_v7  ;;  %v4302_v7 = vpack.c.bf16 %v3596_v6, %v3595_v5  ;;  %v3691_v5 = vld [vmem:[%s5830_s5 + $0x80] sm:$0xff]  ;;  %v3692_v6 = vld [vmem:[%s5830_s5 + $0x88] sm:$0xf] }
 0x305   : > { %4224 = vmatprep.subr.bf16.mxu1 %v4564_v21 }
 0x308   : > { %4226 = vmatpush1.bf16.msra.mxu1 %v4225_v10  ;;  %v4305_v10 = vpack.c.bf16 %v3598_v9, %v3597_v8  ;;  %v2315_v8 = vld [vmem:[%s5832_s7 + $0x8] sm:$0xff]  ;;  %v2233_v9 = vld [vmem:[%s476_s29] sm:$0x1] }
 0x309   : > { %4227 = vmatprep.subr.bf16.mxu1 %v4564_v21 }
 0x30c   : > { %4229 = vmatpush1.bf16.msra.mxu1 %v4228_v13  ;;  %v4308_v13 = vpack.c.bf16 %v3600_v12, %v3599_v11  ;;  %v2316_v11 = vld [vmem:[%s5832_s7 + $0x10] sm:$0xff]  ;;  %v2317_v12 = vld [vmem:[%s5832_s7 + $0x18] sm:$0xff] }
 0x30d   : > { %4230 = vmatprep.subr.bf16.mxu1 %v4564_v21 }
 0x310   : > { %4232 = vmatpush1.bf16.msra.mxu1 %v4231_v16  ;;  %v4311_v16 = vpack.c.bf16 %v3602_v15, %v3601_v14  ;;  %v2318_v14 = vld [vmem:[%s5832_s7 + $0x20] sm:$0xf] }
 0x311   : > { %4233 = vmatprep.subr.bf16.mxu1 %v4564_v21  ;;  %v3311_v15 = vld [vmem:[%s5835_s10] sm:$0xff] }
 0x314   : > { %4235 = vmatpush1.bf16.msra.mxu1 %v4234_v19  ;;  %v4314_v19 = vpack.c.bf16 %v3604_v18, %v3603_v17 }
 0x315   : > { %4236 = vmatprep.subr.bf16.mxu1 %v4564_v21 }
 0x318   : > { %4238 = vmatpush1.bf16.msra.mxu1 %v4237_v23  ;;  %v3608_v23 = vld [vmem:[%s5830_s5 + $0x58] sm:$0xf] }
 0x319   : > { %4239 = vmatprep.subr.bf16.mxu1 %v4564_v21 }
 0x31c   : > { %4241 = vmatpush1.bf16.msra.mxu1 %v4240_v26  ;;  %v3639_v26 = vld [vmem:[%s5829_s4 + $0x4d0] sm:$0xff] }
 0x31d   : > { %4242 = vmatprep.subr.bf16.mxu1 %v4564_v21 }
 0x320   : > { %4244 = vmatpush1.bf16.msra.mxu1 %v4243_v29  ;;  %v4352_v29 = vpack.c.bf16 %v3640_v27, %v3639_v26 }
 0x321   : > { %4245 = vmatprep.subr.bf16.mxu1 %v4564_v21 }
 0x324   : > { %4248 = vmatpush1.bf16.msk.msra.mxu1 %vm4741_vm5, %v4246_v32  ;;  %v1399_v33 = vpop.f32.mrb[10].mxu0  ;;  %v4355_v32 = vpack.c.bf16 %v3642_v31, %v3641_v30  ;;  %v3706_v30 = vld [vmem:[%s5832_s7 + $0x50] sm:$0xff]  ;;  %v3707_v31 = vld [vmem:[%s5832_s7 + $0x58] sm:$0xff] }
 0x325   : > { %v1401_v34 = vpop.f32.mrb[11].mxu0 }
 0x326   : > { %v3644_v34 = vld [vmem:[%s5829_s4 + $0x4f8] sm:$0xff] }
 0x327   : > { %1216 = vmatmul.mubr.f32.vlgmr.msra.gmra.mrb[2].mxu1 %v4762_v62 }
 0x328   : > { %3903 = vmatprep.mubr.msk.f32.mxu1 %vm780_vm7, %v3551_v37 }
 0x350   : > { %v5281_v35 = vpop.f32.mrb[12].mxu0 }
 0x351   : > { %v1765_v36 = vpop.f32.mrb[13].mxu0 }
 0x352   : > { %v3645_v36 = vld [vmem:[%s5829_s4 + $0x500] sm:$0xff] }
 0x37c   : > { %v5286_v38 = vpop.f32.mrb[14].mxu0 }
 0x37d   : > { %v2129_v39 = vpop.f32.mrb[15].mxu0 }
 0x37e   : > { %v3647_v39 = vld [vmem:[%s5829_s4 + $0x510] sm:$0xff] }
 0x3fa   : > { %v1217_v40 = vpop.f32.mrb[2].mxu1 }
 0x3fb   : > { %v1219_v42 = vpop.f32.mrb[3].mxu1  ;;  %3901 = vmatprep.subr.mxu1 %v1217_v40 }
 0x3fc   : > { %3902 = vmatpush3.msra.mxu1 %v1217_v40  ;;  %v3648_v40 = vld [vmem:[%s5829_s4 + $0x518] sm:$0xff]  ;;  %v3649_v42 = vld [vmem:[%s5829_s4 + $0x520] sm:$0xff] }
 0x3fd   : > { %3904 = vmatmul.mubr.msk.f32.vlgmr.msra.gmra.mrb[0].mxu1 %vm780_vm7, %v3552_v41  ;;  %3906 = vmatprep.subr.mxu1 %v1399_v33  ;;  %v4364_v41 = vpack.c.bf16 %v3648_v40, %v3647_v39  ;;  %v3714_v39 = vld [vmem:[%s5832_s7 + $0x80] sm:$0xff]  ;;  %v3710_v40 = vld [vmem:[%s5832_s7 + $0x70] sm:$0xf] }
 0x3fe   : > { %3907 = vmatpush3.msra.mxu1 %v1399_v33  ;;  %3908 = vmatprep.mubr.msk.f32.mxu1 %vm780_vm7, %v3579_v43  ;;  %v3643_v33 = vld [vmem:[%s5829_s4 + $0x4f0] sm:$0xff]  ;;  %v3650_v43 = vld [vmem:[%s5829_s4 + $0x528] sm:$0xff] }
 0x3ff   : > { %4283 = vmatprep.subr.bf16.mxu1 %v4564_v21  ;;  %v4367_v44 = vpack.c.bf16 %v3650_v43, %v3649_v42  ;;  %v3715_v43 = vld [vmem:[%s5832_s7 + $0x88] sm:$0xff] }
 0x405   : > { %3909 = vmatmul.mubr.msk.f32.vlgmr.msra.gmra.mrb[0].mxu1 %vm780_vm7, %v3580_v46  ;;  %v3652_v46 = vld [vmem:[%s5829_s4 + $0x538] sm:$0xff] }
 0x406   : > { %4285 = vmatpush1.bf16.msra.mxu1 %v4284_v47  ;;  %3606 = vmatprep.mubr.msk.f32.mxu1 %vm601_vm6, %v4760_v60  ;;  %v4370_v47 = vpack.c.bf16 %v3652_v46, %v3651_v45  ;;  %v3720_v46 = vld [vmem:[%s5832_s7 + $0xa0] sm:$0xff] }
 0x407   : > { %4286 = vmatprep.subr.bf16.mxu1 %v4564_v21 }
 0x40a   : > { %4288 = vmatpush1.bf16.msra.mxu1 %v4287_v51  ;;  %v4373_v51 = vpack.c.bf16 %v3654_v50, %v3653_v48  ;;  %v3717_v48 = vld [vmem:[%s5832_s7 + $0x98] sm:$0xf] }
 0x40b   : > { %4289 = vmatprep.subr.bf16.mxu1 %v4564_v21 }
 0x40e   : > { %4291 = vmatpush1.bf16.msra.mxu1 %v4290_v54  ;;  %v4376_v54 = vpack.c.bf16 %v3656_v53, %v3655_v52  ;;  %v3722_v52 = vld [vmem:[%s5832_s7 + $0xb0] sm:$0xff]  ;;  %v3723_v53 = vld [vmem:[%s5832_s7 + $0xb8] sm:$0xff] }
 0x40f   : > { %4292 = vmatprep.subr.bf16.mxu1 %v4564_v21 }
 0x412   : > { %4294 = vmatpush1.bf16.msra.mxu1 %v4293_v59  ;;  %v4379_v59 = vpack.c.bf16 %v3658_v58, %v3657_v57  ;;  %v3727_v57 = vld [vmem:[%s5832_s7 + $0xc8] sm:$0xff]  ;;  %v3728_v58 = vld [vmem:[%s5832_s7 + $0xd0] sm:$0xff] }
 0x413   : > { %4295 = vmatprep.subr.bf16.mxu1 %v4564_v21 }
 0x416   : > { %4297 = vmatpush1.bf16.msra.mxu1 %v4296_v0  ;;  %v4382_v0 = vpack.c.bf16 %v3660_v63, %v3659_v61  ;;  %v4450_v61 = vpack.c.bf16 %v3728_v58, %v3727_v57 }
 0x417   : > { %4298 = vmatprep.subr.bf16.mxu1 %v4564_v21 }
 0x41a   : > { %4300 = vmatpush1.bf16.msra.mxu1 %v4299_v4 }
 0x41b   : > { %4301 = vmatprep.subr.bf16.mxu1 %v4564_v21 }
 0x41e   : > { %4303 = vmatpush1.bf16.msra.mxu1 %v4302_v7  ;;  %v2234_v7 = vld [vmem:[%s5833_s8] sm:$0xf] }
 0x41f   : > { %4304 = vmatprep.subr.bf16.mxu1 %v4564_v21 }
 0x422   : > { %4306 = vmatpush1.bf16.msra.mxu1 %v4305_v10 }
 0x423   : > { %4307 = vmatprep.subr.bf16.mxu1 %v4564_v21 }
 0x426   : > { %4309 = vmatpush1.bf16.msra.mxu1 %v4308_v13  ;;  %v4423_v13 = vpack.c.bf16 %v2317_v12, %v2316_v11  ;;  %v3738_v11 = vld [vmem:[%s5832_s7 + $0x110] sm:$0xf] }
 0x427   : > { %4310 = vmatprep.subr.bf16.mxu1 %v4564_v21 }
 0x42a   : > { %4312 = vmatpush1.bf16.msra.mxu1 %v4311_v16  ;;  %v3312_v16 = vld [vmem:[%s5835_s10 + $0x8] sm:$0xff] }
 0x42b   : > { %4313 = vmatprep.subr.bf16.mxu1 %v4564_v21  ;;  %v4492_v17 = vpack.c.bf16 %v3312_v16, %v3311_v15  ;;  %v3744_v15 = vld [vmem:[%s5832_s7 + $0x130] sm:$0xff] }
 0x42d   : > { %4493 = vmatpush3.bf16.msra.mxu0 %v4492_v17  ;;  %v3748_v17 = vld [vmem:[%s5832_s7 + $0x140] sm:$0xff] }
 0x42e   : > { %4316 = vmatpush1.bf16.msk.msra.mxu1 %vm4741_vm5, %v4314_v19  ;;  %4494 = vmatprep.subr.bf16.mxu0 %v4564_v21 }
 0x431   : > { %1580 = vmatmul.mubr.f32.vlgmr.msra.gmra.mrb[4].mxu1 %v4762_v62 }
 0x432   : > { %3913 = vmatprep.mubr.msk.f32.mxu1 %vm780_vm7, %v3607_v20 }
 0x504   : > { %v1581_v22 = vpop.f32.mrb[4].mxu1 }
 0x505   : > { %v1583_v24 = vpop.f32.mrb[5].mxu1  ;;  %3911 = vmatprep.subr.mxu1 %v1581_v22 }
 0x506   : > { %3912 = vmatpush3.msra.mxu1 %v1581_v22  ;;  %v3700_v24 = vld [vmem:[%s5832_s7 + $0x30] sm:$0xff] }
 0x507   : > { %3914 = vmatmul.mubr.msk.f32.vlgmr.msra.gmra.mrb[0].mxu1 %vm780_vm7, %v3608_v23  ;;  %3916 = vmatprep.subr.mxu1 %v5281_v35  ;;  %v3699_v23 = vld [vmem:[%s5832_s7 + $0x28] sm:$0xff] }
 0x508   : > { %3917 = vmatpush3.msra.mxu1 %v5281_v35  ;;  %3918 = vmatprep.mubr.msk.f32.mxu1 %vm780_vm7, %v3635_v25  ;;  %v4358_v35 = vpack.c.bf16 %v3644_v34, %v3643_v33  ;;  %v2222_v25 = vpop.permute.xlu0 %2221  ;;  %v4426_v27 = vpack.c.bf16 %v3700_v24, %v3699_v23  ;;  %v4432_v33 = vpack.c.bf16 %v3707_v31, %v3706_v30  ;;  %v3750_v24 = vld [vmem:[%s5832_s7 + $0x150] sm:$0xff] }
 0x509   : > { %4351 = vmatprep.subr.bf16.mxu1 %v4564_v21 }
 0x50f   : > { %3919 = vmatmul.mubr.msk.f32.vlgmr.msra.gmra.mrb[0].mxu1 %vm780_vm7, %v3636_v28 }
 0x510   : > { %4353 = vmatpush1.bf16.msra.mxu1 %v4352_v29  ;;  %3662 = vmatprep.mubr.msk.f32.mxu1 %vm601_vm6, %v4760_v60  ;;  %v3646_v60 = vld [vmem:[%s5829_s4 + $0x508] sm:$0xff] }
 0x511   : > { %4354 = vmatprep.subr.bf16.mxu1 %v4564_v21  ;;  %v4361_v37 = vpack.c.bf16 %v3646_v60, %v3645_v36  ;;  %v3709_v36 = vld [vmem:[%s5832_s7 + $0x68] sm:$0xff] }
 0x514   : > { %4356 = vmatpush1.bf16.msra.mxu1 %v4355_v32  ;;  %v3703_v32 = vld [vmem:[%s5832_s7 + $0x48] sm:$0xf] }
 0x515   : > { %4357 = vmatprep.subr.bf16.mxu1 %v4564_v21 }
 0x518   : > { %4359 = vmatpush1.bf16.msra.mxu1 %v4358_v35  ;;  %v3708_v35 = vld [vmem:[%s5832_s7 + $0x60] sm:$0xff] }
 0x519   : > { %4360 = vmatprep.subr.bf16.mxu1 %v4564_v21  ;;  %v4435_v60 = vpack.c.bf16 %v3709_v36, %v3708_v35  ;;  %v3763_v35 = vld [vmem:[%s5832_s7 + $0x198] sm:$0xff]  ;;  %v3759_v36 = vld [vmem:[%s5832_s7 + $0x188] sm:$0xf] }
 0x51c   : > { %4362 = vmatpush1.bf16.msra.mxu1 %v4361_v37  ;;  %v3713_v37 = vld [vmem:[%s5832_s7 + $0x78] sm:$0xff] }
 0x51d   : > { %4363 = vmatprep.subr.bf16.mxu1 %v4564_v21 }
 0x520   : > { %4365 = vmatpush1.bf16.msra.mxu1 %v4364_v41  ;;  %v4438_v41 = vpack.c.bf16 %v3714_v39, %v3713_v37  ;;  %v3764_v39 = vld [vmem:[%s5832_s7 + $0x1a0] sm:$0xff] }
 0x521   : > { %4366 = vmatprep.subr.bf16.mxu1 %v4564_v21 }
 0x524   : > { %4368 = vmatpush1.bf16.msra.mxu1 %v4367_v44  ;;  %v3716_v44 = vld [vmem:[%s5832_s7 + $0x90] sm:$0xff] }
 0x525   : > { %4369 = vmatprep.subr.bf16.mxu1 %v4564_v21  ;;  %v4441_v45 = vpack.c.bf16 %v3716_v44, %v3715_v43  ;;  %v3770_v43 = vld [vmem:[%s5832_s7 + $0x1c0] sm:$0xff]  ;;  %v3766_v44 = vld [vmem:[%s5832_s7 + $0x1b0] sm:$0xf] }
 0x528   : > { %4371 = vmatpush1.bf16.msra.mxu1 %v4370_v47  ;;  %v3721_v47 = vld [vmem:[%s5832_s7 + $0xa8] sm:$0xff] }
 0x529   : > { %4372 = vmatprep.subr.bf16.mxu1 %v4564_v21  ;;  %v4444_v50 = vpack.c.bf16 %v3721_v47, %v3720_v46  ;;  %v3771_v47 = vld [vmem:[%s5832_s7 + $0x1c8] sm:$0xff] }
 0x52c   : > { %4374 = vmatpush1.bf16.msra.mxu1 %v4373_v51 }
 0x52d   : > { %4375 = vmatprep.subr.bf16.mxu1 %v4564_v21 }
 0x530   : > { %4377 = vmatpush1.bf16.msra.mxu1 %v4376_v54  ;;  %v4447_v54 = vpack.c.bf16 %v3723_v53, %v3722_v52  ;;  %v3313_v53 = vld [vmem:[%s5835_s10 + $0x10] sm:$0xff] }
 0x531   : > { %4378 = vmatprep.subr.bf16.mxu1 %v4564_v21 }
 0x534   : > { %4380 = vmatpush1.bf16.msra.mxu1 %v4379_v59  ;;  %v3724_v59 = vld [vmem:[%s5832_s7 + $0xc0] sm:$0xf] }
 0x535   : > { %4381 = vmatprep.subr.bf16.mxu1 %v4564_v21 }
 0x538   : > { %4384 = vmatpush1.bf16.msk.msra.mxu1 %vm4741_vm5, %v4382_v0  ;;  %v3729_v0 = vld [vmem:[%s5832_s7 + $0xd8] sm:$0xff] }
 0x53b   : > { %1944 = vmatmul.mubr.f32.vlgmr.msra.gmra.mrb[6].mxu1 %v4762_v62  ;;  %v3664_v62 = vld [vmem:[%s5830_s5 + $0x78] sm:$0xf] }
 0x53c   : > { %3923 = vmatprep.mubr.msk.f32.mxu1 %vm780_vm7, %v3663_v2  ;;  %v3730_v2 = vld [vmem:[%s5832_s7 + $0xe0] sm:$0xff] }
 0x53d   : > { %v4453_v3 = vpack.c.bf16 %v3730_v2, %v3729_v0 }
 0x60e   : > { %v1945_v49 = vpop.f32.mrb[6].mxu1 }
 0x60f   : > { %v1947_v4 = vpop.f32.mrb[7].mxu1  ;;  %3921 = vmatprep.subr.mxu1 %v1945_v49 }
 0x610   : > { %3922 = vmatpush3.msra.mxu1 %v1945_v49  ;;  %v3734_v49 = vld [vmem:[%s5832_s7 + $0xf0] sm:$0xff]  ;;  %v3731_v4 = vld [vmem:[%s5832_s7 + $0xe8] sm:$0xf] }
 0x611   : > { %3924 = vmatmul.mubr.msk.f32.vlgmr.msra.gmra.mrb[0].mxu1 %vm780_vm7, %v3664_v62  ;;  %3926 = vmatprep.subr.mxu1 %v5286_v38  ;;  %v3735_v62 = vld [vmem:[%s5832_s7 + $0xf8] sm:$0xff] }
 0x612   : > { %3927 = vmatpush3.msra.mxu1 %v5286_v38  ;;  %3928 = vmatprep.mubr.msk.f32.mxu1 %vm780_vm7, %v3691_v5  ;;  %v2314_v38 = vld [vmem:[%s5832_s7] sm:$0xff]  ;;  %v4456_v5 = vpack.c.bf16 %v3735_v62, %v3734_v49 }
 0x613   : > { %3931 = vmatprep.subr.mxu1 %v4561_v1  ;;  %v4420_v10 = vpack.c.bf16 %v2315_v8, %v2314_v38  ;;  %v3737_v38 = vld [vmem:[%s5832_s7 + $0x108] sm:$0xff]  ;;  %v3391_v49 = vld [vmem:[%s5837_s12] sm:$0x1] }
 0x619   : > { %3929 = vmatmul.mubr.msk.f32.vlgmr.msra.gmra.mrb[0].mxu1 %vm780_vm7, %v3692_v6 }
 0x61a   : > { %3932 = vmatpush3.msk.msra.mxu1 %vm2240_vm9, %v2234_v7  ;;  %3933 = vmatprep.mubr.msk.f32.mxu1 %vm4565_vm8, %v4561_v1  ;;  %v3736_v7 = vld [vmem:[%s5832_s7 + $0x100] sm:$0xff] }
 0x61b   : > { %4419 = vmatprep.subr.bf16.mxu1 %v4564_v21  ;;  %v4459_v8 = vpack.c.bf16 %v3737_v38, %v3736_v7 }
 0x61d   : > { %3934 = vmatmul.mubr.msk.f32.vlgmr.msra.gmra.mrb[8].mxu1 %vm2236_vm10, %v2233_v9  ;;  %v3741_v9 = vld [vmem:[%s5832_s7 + $0x118] sm:$0xff] }
 0x61e   : > { %4421 = vmatpush3.bf16.msra.mxu1 %v4420_v10  ;;  %3946 = vmatprep.mubr.msk.f32.mxu1 %vm4565_vm8, %v4561_v1  ;;  %v3742_v10 = vld [vmem:[%s5832_s7 + $0x120] sm:$0xff] }
 0x61f   : > { %4422 = vmatprep.subr.bf16.mxu1 %v4564_v21  ;;  %v4462_v12 = vpack.c.bf16 %v3742_v10, %v3741_v9 }
 0x622   : > { %4424 = vmatpush3.bf16.msra.mxu1 %v4423_v13 }
 0x623   : > { %3944 = vmatprep.subr.mxu1 %v4561_v1 }
 0x626   : > { %3945 = vmatpush3.msk.msra.mxu1 %vm2240_vm9, %v2318_v14  ;;  %v3743_v14 = vld [vmem:[%s5832_s7 + $0x128] sm:$0xff] }
 0x627   : > { %4425 = vmatprep.subr.bf16.mxu1 %v4564_v21  ;;  %v4465_v16 = vpack.c.bf16 %v3744_v15, %v3743_v14 }
 0x6ec   : > { %v3930_v18 = vpop.f32.mrb[0].mxu1 }
 0x6ed   : > { %v5547_v19 = vadd.f32 %v3930_v18, %v5191_v55  ;;  %v2206_v20 = vpop.f32.mrb[1].mxu1  ;;  %v3701_v55 = vld [vmem:[%s5832_s7 + $0x38] sm:$0xff]  ;;  %v3749_v18 = vld [vmem:[%s5832_s7 + $0x148] sm:$0xff] }
 0x6ee   : > { %v4498_v22 = vadd.f32 %v2206_v20, %v5193_v56  ;;  %v3702_v56 = vld [vmem:[%s5832_s7 + $0x40] sm:$0xff]  ;;  %v3745_v20 = vld [vmem:[%s5832_s7 + $0x138] sm:$0xf] }
 0x6ef   : > { %v4429_v29 = vpack.c.bf16 %v3702_v56, %v3701_v55  ;;  %v3755_v55 = vld [vmem:[%s5832_s7 + $0x168] sm:$0xff]  ;;  %v3756_v56 = vld [vmem:[%s5832_s7 + $0x170] sm:$0xff] }
 0x6f0   : > { %v2229_v26 = vadd.f32 %v4498_v22, %v2222_v25  ;;  %v4468_v22 = vpack.c.bf16 %v3749_v18, %v3748_v17  ;;  %v3751_v25 = vld [vmem:[%s5832_s7 + $0x158] sm:$0xff]  ;;  %v4474_v30 = vpack.c.bf16 %v3756_v56, %v3755_v55 }
 0x6f2   : > { %v5556_v28 = vmax.f32 %v2229_v26, 0.0  ;;  %v2227_v26 = vpop.permute.xlu1 %2226 }
 0x6f4   : > { %3947 = vmatmul.mubr.msk.f32.vlgmr.msra.gmra.mrb[8].mxu1 %vm2319_vm11, %v5556_v28  ;;  %v2403_v34 = vrot.slane %v5556_v28, 1  ;;  %v2486_v42 = vrot.slane %v5556_v28, 2  ;;  %v2569_v51 = vrot.slane %v5556_v28, 3  ;;  %v2652_v63 = vrot.slane %v5556_v28, 4 }
 0x6f5   : > { %4427 = vmatpush3.bf16.msra.mxu1 %v4426_v27  ;;  %3959 = vmatprep.mubr.msk.f32.mxu1 %vm4565_vm8, %v4561_v1  ;;  %v2735_v6 = vrot.slane %v5556_v28, 5  ;;  %v2818_v13 = vrot.slane %v5556_v28, 6  ;;  %v2901_v23 = vrot.slane %v5556_v28, 7  ;;  %v4471_v27 = vpack.c.bf16 %v3751_v25, %v3750_v24 }
 0x6f6   : > { %4428 = vmatprep.subr.bf16.mxu1 %v4564_v21  ;;  %v2230_v28 = vadd.f32 %v5547_v19, %v2227_v26  ;;  %v3757_v19 = vld [vmem:[%s5832_s7 + $0x178] sm:$0xff] }
 0x6f8   : > { %v2232_v31 = vmax.f32 %v2230_v28, 0.0 }
 0x6f9   : > { %4430 = vmatpush3.bf16.msra.mxu1 %v4429_v29  ;;  %v3752_v29 = vld [vmem:[%s5832_s7 + $0x160] sm:$0xf] }
 0x6fa   : > { %3957 = vmatprep.subr.mxu1 %v4561_v1  ;;  %v3067_v37 = vrot.slane %v2232_v31, 1  ;;  %v3150_v46 = vrot.slane %v2232_v31, 2  ;;  %v3233_v52 = vrot.slane %v2232_v31, 3 }
 0x6fd   : > { %3958 = vmatpush3.msk.msra.mxu1 %vm2240_vm9, %v3703_v32  ;;  %v3758_v32 = vld [vmem:[%s5832_s7 + $0x180] sm:$0xff] }
 0x6fe   : > { %3960 = vmatmul.mubr.msk.f32.vlgmr.msra.gmra.mrb[8].mxu1 %vm2319_vm11, %v2403_v34  ;;  %4431 = vmatprep.subr.bf16.mxu1 %v4564_v21  ;;  %v3762_v34 = vld [vmem:[%s5832_s7 + $0x190] sm:$0xff] }
 0x6ff   : > { %4433 = vmatpush3.bf16.msra.mxu1 %v4432_v33  ;;  %3972 = vmatprep.mubr.msk.f32.mxu1 %vm4565_vm8, %v4561_v1  ;;  %v4477_v33 = vpack.c.bf16 %v3758_v32, %v3757_v19 }
 0x700   : > { %4434 = vmatprep.subr.bf16.mxu1 %v4564_v21 }
 0x703   : > { %4436 = vmatpush3.bf16.msra.mxu1 %v4435_v60  ;;  %v4480_v60 = vpack.c.bf16 %v3763_v35, %v3762_v34 }
 0x704   : > { %3970 = vmatprep.subr.mxu1 %v4561_v1 }
 0x707   : > { %3971 = vmatpush3.msk.msra.mxu1 %vm2240_vm9, %v3710_v40  ;;  %v3765_v40 = vld [vmem:[%s5832_s7 + $0x1a8] sm:$0xff] }
 0x708   : > { %3973 = vmatmul.mubr.msk.f32.vlgmr.msra.gmra.mrb[8].mxu1 %vm2319_vm11, %v2486_v42  ;;  %4437 = vmatprep.subr.bf16.mxu1 %v4564_v21  ;;  %v3769_v42 = vld [vmem:[%s5832_s7 + $0x1b8] sm:$0xff] }
 0x709   : > { %4439 = vmatpush3.bf16.msra.mxu1 %v4438_v41  ;;  %3985 = vmatprep.mubr.msk.f32.mxu1 %vm4565_vm8, %v4561_v1  ;;  %v4483_v41 = vpack.c.bf16 %v3765_v40, %v3764_v39 }
 0x70a   : > { %4440 = vmatprep.subr.bf16.mxu1 %v4564_v21 }
 0x70d   : > { %4442 = vmatpush3.bf16.msra.mxu1 %v4441_v45  ;;  %v4486_v45 = vpack.c.bf16 %v3770_v43, %v3769_v42 }
 0x70e   : > { %3983 = vmatprep.subr.mxu1 %v4561_v1 }
 0x711   : > { %3984 = vmatpush3.msk.msra.mxu1 %vm2240_vm9, %v3717_v48  ;;  %v3772_v48 = vld [vmem:[%s5832_s7 + $0x1d0] sm:$0xff] }
 0x712   : > { %3986 = vmatmul.mubr.msk.f32.vlgmr.msra.gmra.mrb[8].mxu1 %vm2319_vm11, %v2569_v51  ;;  %4443 = vmatprep.subr.bf16.mxu1 %v4564_v21  ;;  %v3773_v51 = vld [vmem:[%s5832_s7 + $0x1d8] sm:$0xf] }
 0x713   : > { %4445 = vmatpush3.bf16.msra.mxu1 %v4444_v50  ;;  %3998 = vmatprep.mubr.msk.f32.mxu1 %vm4565_vm8, %v4561_v1  ;;  %v4489_v50 = vpack.c.bf16 %v3772_v48, %v3771_v47 }
 0x714   : > { %4446 = vmatprep.subr.bf16.mxu1 %v4564_v21 }
 0x717   : > { %4448 = vmatpush3.bf16.msra.mxu1 %v4447_v54 }
 0x718   : > { %3996 = vmatprep.subr.mxu1 %v4561_v1 }
 0x71b   : > { %3997 = vmatpush3.msk.msra.mxu1 %vm2240_vm9, %v3724_v59 }
 0x71c   : > { %3999 = vmatmul.mubr.msk.f32.vlgmr.msra.gmra.mrb[8].mxu1 %vm2319_vm11, %v2652_v63  ;;  %4449 = vmatprep.subr.bf16.mxu1 %v4564_v21  ;;  %v3315_v63 = vld [vmem:[%s5836_s11] sm:$0x1] }
 0x71d   : > { %4451 = vmatpush3.bf16.msra.mxu1 %v4450_v61  ;;  %4011 = vmatprep.mubr.msk.f32.mxu1 %vm4565_vm8, %v4561_v1 }
 0x71e   : > { %4452 = vmatprep.subr.bf16.mxu1 %v4564_v21 }
 0x721   : > { %4454 = vmatpush3.bf16.msra.mxu1 %v4453_v3 }
 0x722   : > { %4009 = vmatprep.subr.mxu1 %v4561_v1 }
 0x725   : > { %4010 = vmatpush3.msk.msra.mxu1 %vm2240_vm9, %v3731_v4 }
 0x726   : > { %4012 = vmatmul.mubr.msk.f32.vlgmr.msra.gmra.mrb[8].mxu1 %vm2319_vm11, %v2735_v6  ;;  %4455 = vmatprep.subr.bf16.mxu1 %v4564_v21  ;;  %v3397_v6 = vld [vmem:[#allocation2] sm:$0x1] }
 0x727   : > { %4457 = vmatpush3.bf16.msra.mxu1 %v4456_v5  ;;  %4024 = vmatprep.mubr.msk.f32.mxu1 %vm4565_vm8, %v4561_v1 }
 0x728   : > { %4458 = vmatprep.subr.bf16.mxu1 %v4564_v21 }
 0x72b   : > { %4460 = vmatpush3.bf16.msra.mxu1 %v4459_v8 }
 0x72c   : > { %4022 = vmatprep.subr.mxu1 %v4561_v1 }
 0x72f   : > { %4023 = vmatpush3.msk.msra.mxu1 %vm2240_vm9, %v3738_v11 }
 0x730   : > { %4025 = vmatmul.mubr.msk.f32.vlgmr.msra.gmra.mrb[8].mxu1 %vm2319_vm11, %v2818_v13  ;;  %4461 = vmatprep.subr.bf16.mxu1 %v4564_v21 }
 0x731   : > { %4463 = vmatpush3.bf16.msra.mxu1 %v4462_v12  ;;  %4037 = vmatprep.mubr.msk.f32.mxu1 %vm4565_vm8, %v4561_v1 }
 0x732   : > { %4464 = vmatprep.subr.bf16.mxu1 %v4564_v21 }
 0x735   : > { %4466 = vmatpush3.bf16.msra.mxu1 %v4465_v16 }
 0x736   : > { %4035 = vmatprep.subr.mxu1 %v4561_v1 }
 0x739   : > { %4036 = vmatpush3.msk.msra.mxu1 %vm2240_vm9, %v3745_v20 }
 0x73a   : > { %4038 = vmatmul.mubr.msk.f32.vlgmr.msra.gmra.mrb[8].mxu1 %vm2319_vm11, %v2901_v23  ;;  %4467 = vmatprep.subr.bf16.mxu1 %v4564_v21 }
 0x73b   : > { %4469 = vmatpush3.bf16.msra.mxu1 %v4468_v22  ;;  %4050 = vmatprep.mubr.msk.f32.mxu1 %vm4565_vm8, %v4561_v1 }
 0x73c   : > { %4470 = vmatprep.subr.bf16.mxu1 %v4564_v21 }
 0x73f   : > { %4472 = vmatpush3.bf16.msra.mxu1 %v4471_v27 }
 0x740   : > { %4048 = vmatprep.subr.mxu1 %v4561_v1 }
 0x743   : > { %4049 = vmatpush3.msk.msra.mxu1 %vm2240_vm9, %v3752_v29 }
 0x744   : > { %4051 = vmatmul.mubr.msk.f32.vlgmr.msra.gmra.mrb[8].mxu1 %vm2319_vm11, %v2232_v31  ;;  %4473 = vmatprep.subr.bf16.mxu1 %v4564_v21 }
 0x745   : > { %4475 = vmatpush3.bf16.msra.mxu1 %v4474_v30  ;;  %4063 = vmatprep.mubr.msk.f32.mxu1 %vm4565_vm8, %v4561_v1 }
 0x746   : > { %4476 = vmatprep.subr.bf16.mxu1 %v4564_v21 }
 0x749   : > { %4478 = vmatpush3.bf16.msra.mxu1 %v4477_v33 }
 0x74a   : > { %4061 = vmatprep.subr.mxu1 %v4561_v1 }
 0x74d   : > { %4062 = vmatpush3.msk.msra.mxu1 %vm2240_vm9, %v3759_v36 }
 0x74e   : > { %4064 = vmatmul.mubr.msk.f32.vlgmr.msra.gmra.mrb[8].mxu1 %vm2319_vm11, %v3067_v37  ;;  %4479 = vmatprep.subr.bf16.mxu1 %v4564_v21 }
 0x74f   : > { %4481 = vmatpush3.bf16.msra.mxu1 %v4480_v60  ;;  %4076 = vmatprep.mubr.msk.f32.mxu1 %vm4565_vm8, %v4561_v1 }
 0x750   : > { %4482 = vmatprep.subr.bf16.mxu1 %v4564_v21 }
 0x753   : > { %4484 = vmatpush3.bf16.msra.mxu1 %v4483_v41 }
 0x754   : > { %4074 = vmatprep.subr.mxu1 %v4561_v1 }
 0x757   : > { %4075 = vmatpush3.msk.msra.mxu1 %vm2240_vm9, %v3766_v44 }
 0x758   : > { %4077 = vmatmul.mubr.msk.f32.vlgmr.msra.gmra.mrb[8].mxu1 %vm2319_vm11, %v3150_v46  ;;  %4485 = vmatprep.subr.bf16.mxu1 %v4564_v21 }
 0x759   : > { %4487 = vmatpush3.bf16.msra.mxu1 %v4486_v45  ;;  %4089 = vmatprep.mubr.msk.f32.mxu1 %vm4565_vm8, %v4561_v1 }
 0x75a   : > { %4488 = vmatprep.subr.bf16.mxu1 %v4564_v21  ;;  %v3314_v21 = vld [vmem:[%s5835_s10 + $0x18] sm:$0xff] }
 0x75b   : > { %v4495_v54 = vpack.c.bf16 %v3314_v21, %v3313_v53 }
 0x75d   : > { %4490 = vmatpush3.bf16.msra.mxu1 %v4489_v50  ;;  %4496 = vmatpush3.bf16.msra.mxu0 %v4495_v54 }
 0x75e   : > { %4087 = vmatprep.subr.mxu1 %v4561_v1  ;;  %v2235_v1 = vld [vmem:[%s5834_s9] sm:$0x1] }
 0x761   : > { %4088 = vmatpush3.msk.msra.mxu1 %vm2240_vm9, %v3773_v51 }
 0x762   : > { %4090 = vmatmul.mubr.msk.f32.vlgmr.msra.gmra.mrb[8].mxu1 %vm2319_vm11, %v3233_v52 }
 0x835   : > { %v3305_v57 = vpop.f32.mrb[8].mxu1 }
 0x836   : > { %v4499_v58 = vadd.f32 %v3305_v57, %v2235_v1  ;;  %v4091_v59 = vpop.f32.mrb[9].mxu1 }
 0x838   : > { %v3310_v61 = vmax.f32 %v4499_v58, 0.0 }
 0x83a   : > { %4101 = vmatmul.mubr.msk.f32.vlgmr.msra.gmra.mrb[16].mxu0 %vm3316_vm12, %v3310_v61 }
 0x90d   : > { %v3386_v0 = vpop.f32.mrb[16].mxu0 }
 0x90e   : > { %v3387_v2 = vadd.f32 %v3386_v0, %v3315_v63  ;;  %v4102_v3 = vpop.f32.mrb[17].mxu0 }
 0x910   : > { %v3390_v62 = vmax.f32 %v3387_v2, 0.0 }
 0x912   : > { %v3392_v4 = vmul.f32 %v3391_v49, %v3390_v62 }
 0x914   : > { %v3394_v5 = vsel %vm3393_vm13, %v3392_v4, 0.0 }
 0x915   : > { %3395 = vadd.xlane.f32.xlu1 %v3394_v5 }
 0x9a2   : > { %v3396_v7 = vpop.xlane.xlu1 %3395 }
 0x9a3   : > { %v3398_v38 = vadd.f32 %v3397_v6, %v3396_v7 }
 0x9a5   : > { %3400 = vst.msk [vmem:[%s479_s13] sm:$0x1] %vm3399_vm14, %v3398_v38 }
 0x9a6 PF: > { %s26_s15 = sadd.s32 1, %s4559_s15  }
 0x9a7   : > { %p23_p4 = scmp.ge.s32.totalorder %s26_s15, 4  }
 0x9a9   :  { %25 = sbr.rel (!%p23_p4) target bundleno = 3 (0x3), region = 136 }

</bundles_post_ra>
